<compile_context>
chip_gen: v6e
topology: v6e:2x2x1
jax: 0.10.0
libtpu: 0.0.40
codegen_flags: <defaults>
</compile_context>

<pallas_src>
import functools

import jax
import jax.numpy as jnp
from jax import lax
from jax.experimental import pallas as pl
from jax.experimental.pallas import tpu as pltpu

_SINKHORN_EPS = 0.001   # SinkhornDistance(eps=0.001)
_MAX_ITER = 10          # SinkhornDistance(max_iter=10)
_THRESH = 0.1
# Fully unroll the fixed-trip Sinkhorn loop only while the (B, N, M) working
# set is small; at production point-cloud sizes a rolled loop avoids vreg
# spill / VMEM pressure from overlapping live ranges.
_UNROLL_MAX_ELEMS = 128 * 1024


def _l2_normalize(x):
    # F.normalize(x, p=2, dim=-1, eps=1e-12): x / max(||x||_2, 1e-12)
    sq = jnp.sum(x * x, axis=-1, keepdims=True)
    return x * lax.rsqrt(jnp.maximum(sq, 1e-24))


def _l1_normalize(x):
    # F.normalize(x, p=1, dim=-1, eps=1e-12)
    n = jnp.sum(jnp.abs(x), axis=-1, keepdims=True)
    return x / jnp.maximum(n, 1e-12)


def _lse(x, axis):
    # Stabilized logsumexp, keepdims so the result drops straight into the
    # dual carries without re-broadcasting.
    m = jnp.max(x, axis=axis, keepdims=True)
    return m + jnp.log(jnp.sum(jnp.exp(x - m), axis=axis, keepdims=True))


def _emd_loss_kernel(a_ref, b_ref, out_ref, *, transposed, unroll):
    a = a_ref[...].astype(jnp.float32)   # (B, N, D)
    b = b_ref[...].astype(jnp.float32)   # (B, M, D)
    B = a.shape[0]

    # ---- get_batchcost: L2-normalize + batched similarity matmul ----
    an = _l2_normalize(a)
    bn = _l2_normalize(b)

    if transposed:
        # Big tensors stored as (B, M, N): the larger point set N sits on the
        # 128-lane axis.  Pure storage transpose; axes below are relabeled so
        # the recurrence is identical to the PyTorch code.
        S = jnp.einsum("bmd,bnd->bmn", bn, an,
                       preferred_element_type=jnp.float32)   # S_T[b, m, n]
        n_axis, m_axis = 2, 1
    else:
        S = jnp.einsum("bnd,bmd->bnm", an, bn,
                       preferred_element_type=jnp.float32)   # S[b, n, m]
        n_axis, m_axis = 1, 2

    # ---- get_batchweights (detached cost; forward-only anyway) ----
    margin_a = jnp.mean(S, axis=m_axis)                       # (B, N)
    margin_b = jnp.mean(S, axis=n_axis)                       # (B, M)
    wa = _l1_normalize(jnp.maximum(_l1_normalize(margin_a), 0.0))
    wb = _l1_normalize(jnp.maximum(_l1_normalize(margin_b), 0.0))

    # ---- SinkhornDistance, log domain, duals carried in the /eps domain ----
    # Only ONE big tensor stays live across the loop: neg_cost_eps = -C/eps.
    inv_eps = 1.0 / _SINKHORN_EPS
    neg_cost_eps = (S - 1.0) * inv_eps                        # (B, ., .)
    log_mu = jnp.expand_dims(jnp.log(wa + 1e-8), m_axis)      # 1 on the m axis
    log_nu = jnp.expand_dims(jnp.log(wb + 1e-8), n_axis)      # 1 on the n axis

    def body(_, state):
        u_s, v_s, done = state
        # Algebraic cancellation: the dual being updated is constant along the
        # reduced axis, so it drops out of the stabilized LSE exactly.
        u_new = log_mu - _lse(neg_cost_eps + v_s, axis=m_axis)
        v_new = log_nu - _lse(neg_cost_eps + u_new, axis=n_axis)
        # PyTorch err = mean_b(sum_n |u - u1|) in the un-scaled domain.
        err = (_SINKHORN_EPS / B) * jnp.sum(
            jnp.abs(u_new - u_s), axis=(0, 1, 2), keepdims=True)   # (1,1,1)
        keep = done > 0.0                                          # (1,1,1)
        u_out = jnp.where(keep, u_s, u_new)
        v_out = jnp.where(keep, v_s, v_new)
        done_out = jnp.maximum(done, (err < _THRESH).astype(jnp.float32))
        return (u_out, v_out, done_out)

    u0 = jnp.zeros_like(log_mu)
    v0 = jnp.zeros_like(log_nu)
    done0 = jnp.zeros((1, 1, 1), jnp.float32)
    # Static trip count + vector-shaped `done` mask reproduces the PyTorch
    # break-after-update output values exactly, with no per-iteration
    # vector->sreg synchronization.
    u_s, v_s, _ = lax.fori_loop(0, _MAX_ITER, body, (u0, v0, done0),
                                unroll=unroll)

    # ---- transport plan + loss:  C = -eps * neg_cost_eps ----
    pi = jnp.exp(neg_cost_eps + u_s + v_s)
    d = jnp.sum(pi * neg_cost_eps, axis=2)
    d = jnp.sum(d, axis=1, keepdims=True) * (-_SINKHORN_EPS)   # (B, 1)

    # if torch.isnan(D.sum()): D.fill_(1)
    d = jnp.where(jnp.isnan(jnp.sum(d)), jnp.ones_like(d), d)

    out_ref[...] = d.astype(out_ref.dtype)


def emd_loss(a, b):
    """EMDLoss(reduction='none').forward(a, b) -> (B,) float32."""
    B, N, D = a.shape
    Bb, M, Db = b.shape
    assert B == Bb, "Batch size unmatched!"
    assert D == Db, "vector dimension unmatched!"

    # Put the larger of (N, M) on the 128-lane axis of the big working tensors.
    transposed = N > M
    big_elems = B * N * M
    unroll = big_elems <= _UNROLL_MAX_ELEMS

    # VMEM budget: inputs (double-buffered by the pipeline) plus ~6 live
    # (B, N, M) f32 tensors (neg_cost_eps, LSE/exp temporaries, pi).  Floor at
    # the 32 MiB default, cap at 64 MiB so the request is valid on v7x too.
    est_bytes = 2 * 4 * (a.size + b.size) + 6 * 4 * big_elems
    vmem_limit = int(min(max(32 << 20, est_bytes), 64 << 20))

    kernel = functools.partial(_emd_loss_kernel,
                               transposed=transposed, unroll=unroll)
    out = pl.pallas_call(
        kernel,
        out_shape=jax.ShapeDtypeStruct((B, 1), jnp.float32),
        grid=(1,),
        in_specs=[
            pl.BlockSpec((B, N, D), lambda i: (0, 0, 0)),
            pl.BlockSpec((B, M, Db), lambda i: (0, 0, 0)),
        ],
        out_specs=pl.BlockSpec((B, 1), lambda i: (0, 0)),
        compiler_params=pltpu.CompilerParams(
            dimension_semantics=("arbitrary",),
            vmem_limit_bytes=vmem_limit),
    )(a, b)
    return out[:, 0]


if __name__ == "__main__":
    key = jax.random.PRNGKey(0)
    ka, kb = jax.random.split(key)
    B, N, M, D = 2, 8, 8, 32
    a = jax.random.normal(ka, (B, N, D), dtype=jnp.float32)
    b = jax.random.normal(kb, (B, M, D), dtype=jnp.float32)

    out = emd_loss(a, b)
    jax.block_until_ready(out)
    assert out.shape == (B,) and out.dtype == jnp.float32
    assert bool(jnp.all(jnp.isfinite(out)))
    print("KERNEL_OK")
</pallas_src>

<mosaic_0001>
module attributes {stable_mosaic.version = 11 : i64} {
  func.func @_emd_loss_kernel(%arg0: i32, %arg1: memref<2x8x32xf32, #tpu.memory_space<vmem>>, %arg2: memref<2x8x32xf32, #tpu.memory_space<vmem>>, %arg3: memref<2x1xf32, #tpu.memory_space<vmem>>) attributes {dimension_semantics = [#tpu.dimension_semantics<arbitrary>], iteration_bounds = array<i64: 1>, scalar_prefetch = 0 : i64, scratch_operands = 0 : i64, tpu.core_type = #tpu.core_type<tc>, window_params = [{pipeline_mode = #tpu.pipeline_mode<synchronous>, transform_indices = @transform_0, window_bounds = array<i64: 2, 8, 32>}, {pipeline_mode = #tpu.pipeline_mode<synchronous>, transform_indices = @transform_1, window_bounds = array<i64: 2, 8, 32>}, {pipeline_mode = #tpu.pipeline_mode<synchronous>, transform_indices = @transform_2, window_bounds = array<i64: 2, 1>}]} {
    %c0 = arith.constant 0 : index
    %c0_0 = arith.constant 0 : index
    %c0_1 = arith.constant 0 : index
    %0 = vector.load %arg1[%c0, %c0_0, %c0_1] : memref<2x8x32xf32, #tpu.memory_space<vmem>>, vector<2x8x32xf32>
    %c0_2 = arith.constant 0 : index
    %c0_3 = arith.constant 0 : index
    %c0_4 = arith.constant 0 : index
    %1 = vector.load %arg2[%c0_2, %c0_3, %c0_4] : memref<2x8x32xf32, #tpu.memory_space<vmem>>, vector<2x8x32xf32>
    %2 = arith.mulf %0, %0 : vector<2x8x32xf32>
    %cst = arith.constant dense<0.000000e+00> : vector<2x8xf32>
    %3 = vector.multi_reduction <add>, %2, %cst [2] : vector<2x8x32xf32> to vector<2x8xf32>
    %4 = vector.shape_cast %3 : vector<2x8xf32> to vector<2x8x1xf32>
    %cst_5 = arith.constant 1.000000e-24 : f32
    %5 = vector.broadcast %cst_5 : f32 to vector<2x8x1xf32>
    %6 = arith.maximumf %4, %5 : vector<2x8x1xf32>
    %7 = math.rsqrt %6 : vector<2x8x1xf32>
    %8 = vector.broadcast %7 : vector<2x8x1xf32> to vector<2x8x32xf32>
    %9 = arith.mulf %0, %8 : vector<2x8x32xf32>
    %10 = arith.mulf %1, %1 : vector<2x8x32xf32>
    %cst_6 = arith.constant dense<0.000000e+00> : vector<2x8xf32>
    %11 = vector.multi_reduction <add>, %10, %cst_6 [2] : vector<2x8x32xf32> to vector<2x8xf32>
    %12 = vector.shape_cast %11 : vector<2x8xf32> to vector<2x8x1xf32>
    %cst_7 = arith.constant 1.000000e-24 : f32
    %13 = vector.broadcast %cst_7 : f32 to vector<2x8x1xf32>
    %14 = arith.maximumf %12, %13 : vector<2x8x1xf32>
    %15 = math.rsqrt %14 : vector<2x8x1xf32>
    %16 = vector.broadcast %15 : vector<2x8x1xf32> to vector<2x8x32xf32>
    %17 = arith.mulf %1, %16 : vector<2x8x32xf32>
    "tpu.trace_start"() <{level = 10 : i32, message = "bnd,bmd->bnm"}> : () -> ()
    %cst_8 = arith.constant dense<0.000000e+00> : vector<2x8x8xf32>
    %18 = tpu.matmul %9, %17, %cst_8 {dimension_numbers = #tpu.dot_dimension_numbers<[2], [2], [1], [1], [0, 0, 0, 1, 1, 1], [0], [0]>} : vector<2x8x32xf32>, vector<2x8x32xf32>, vector<2x8x8xf32> -> vector<2x8x8xf32>
    "tpu.trace_stop"() : () -> ()
    %cst_9 = arith.constant dense<0.000000e+00> : vector<2x8xf32>
    %19 = vector.multi_reduction <add>, %18, %cst_9 [2] : vector<2x8x8xf32> to vector<2x8xf32>
    %cst_10 = arith.constant 8.000000e+00 : f32
    %20 = vector.broadcast %cst_10 : f32 to vector<2x8xf32>
    %21 = arith.divf %19, %20 : vector<2x8xf32>
    %cst_11 = arith.constant dense<0.000000e+00> : vector<2x8xf32>
    %22 = vector.multi_reduction <add>, %18, %cst_11 [1] : vector<2x8x8xf32> to vector<2x8xf32>
    %cst_12 = arith.constant 8.000000e+00 : f32
    %23 = vector.broadcast %cst_12 : f32 to vector<2x8xf32>
    %24 = arith.divf %22, %23 : vector<2x8xf32>
    %25 = math.absf %21 : vector<2x8xf32>
    %cst_13 = arith.constant dense<0.000000e+00> : vector<2xf32>
    %26 = vector.multi_reduction <add>, %25, %cst_13 [1] : vector<2x8xf32> to vector<2xf32>
    %27 = vector.shape_cast %26 : vector<2xf32> to vector<2x1xf32>
    %cst_14 = arith.constant 9.99999996E-13 : f32
    %28 = vector.broadcast %cst_14 : f32 to vector<2x1xf32>
    %29 = arith.maximumf %27, %28 : vector<2x1xf32>
    %30 = vector.broadcast %29 : vector<2x1xf32> to vector<2x8xf32>
    %31 = arith.divf %21, %30 : vector<2x8xf32>
    %cst_15 = arith.constant 0.000000e+00 : f32
    %32 = vector.broadcast %cst_15 : f32 to vector<2x8xf32>
    %33 = arith.maximumf %31, %32 : vector<2x8xf32>
    %34 = math.absf %33 : vector<2x8xf32>
    %cst_16 = arith.constant dense<0.000000e+00> : vector<2xf32>
    %35 = vector.multi_reduction <add>, %34, %cst_16 [1] : vector<2x8xf32> to vector<2xf32>
    %36 = vector.shape_cast %35 : vector<2xf32> to vector<2x1xf32>
    %cst_17 = arith.constant 9.99999996E-13 : f32
    %37 = vector.broadcast %cst_17 : f32 to vector<2x1xf32>
    %38 = arith.maximumf %36, %37 : vector<2x1xf32>
    %39 = vector.broadcast %38 : vector<2x1xf32> to vector<2x8xf32>
    %40 = arith.divf %33, %39 : vector<2x8xf32>
    %41 = math.absf %24 : vector<2x8xf32>
    %cst_18 = arith.constant dense<0.000000e+00> : vector<2xf32>
    %42 = vector.multi_reduction <add>, %41, %cst_18 [1] : vector<2x8xf32> to vector<2xf32>
    %43 = vector.shape_cast %42 : vector<2xf32> to vector<2x1xf32>
    %cst_19 = arith.constant 9.99999996E-13 : f32
    %44 = vector.broadcast %cst_19 : f32 to vector<2x1xf32>
    %45 = arith.maximumf %43, %44 : vector<2x1xf32>
    %46 = vector.broadcast %45 : vector<2x1xf32> to vector<2x8xf32>
    %47 = arith.divf %24, %46 : vector<2x8xf32>
    %cst_20 = arith.constant 0.000000e+00 : f32
    %48 = vector.broadcast %cst_20 : f32 to vector<2x8xf32>
    %49 = arith.maximumf %47, %48 : vector<2x8xf32>
    %50 = math.absf %49 : vector<2x8xf32>
    %cst_21 = arith.constant dense<0.000000e+00> : vector<2xf32>
    %51 = vector.multi_reduction <add>, %50, %cst_21 [1] : vector<2x8xf32> to vector<2xf32>
    %52 = vector.shape_cast %51 : vector<2xf32> to vector<2x1xf32>
    %cst_22 = arith.constant 9.99999996E-13 : f32
    %53 = vector.broadcast %cst_22 : f32 to vector<2x1xf32>
    %54 = arith.maximumf %52, %53 : vector<2x1xf32>
    %55 = vector.broadcast %54 : vector<2x1xf32> to vector<2x8xf32>
    %56 = arith.divf %49, %55 : vector<2x8xf32>
    %cst_23 = arith.constant 1.000000e+00 : f32
    %57 = vector.broadcast %cst_23 : f32 to vector<2x8x8xf32>
    %58 = arith.subf %18, %57 : vector<2x8x8xf32>
    %cst_24 = arith.constant 1.000000e+03 : f32
    %59 = vector.broadcast %cst_24 : f32 to vector<2x8x8xf32>
    %60 = arith.mulf %58, %59 : vector<2x8x8xf32>
    %cst_25 = arith.constant 9.99999993E-9 : f32
    %61 = vector.broadcast %cst_25 : f32 to vector<2x8xf32>
    %62 = arith.addf %40, %61 : vector<2x8xf32>
    %63 = math.log %62 : vector<2x8xf32>
    %64 = vector.shape_cast %63 : vector<2x8xf32> to vector<2x8x1xf32>
    %cst_26 = arith.constant 9.99999993E-9 : f32
    %65 = vector.broadcast %cst_26 : f32 to vector<2x8xf32>
    %66 = arith.addf %56, %65 : vector<2x8xf32>
    %67 = math.log %66 : vector<2x8xf32>
    %68 = vector.shape_cast %67 : vector<2x8xf32> to vector<2x1x8xf32>
    %cst_27 = arith.constant 0.000000e+00 : f32
    %69 = vector.broadcast %cst_27 : f32 to vector<2x8x1xf32>
    %cst_28 = arith.constant 0.000000e+00 : f32
    %70 = vector.broadcast %cst_28 : f32 to vector<2x1x8xf32>
    %cst_29 = arith.constant 0.000000e+00 : f32
    %71 = vector.broadcast %cst_29 : f32 to vector<1x1x1xf32>
    %c0_i32 = arith.constant 0 : i32
    %72 = vector.broadcast %70 : vector<2x1x8xf32> to vector<2x8x8xf32>
    %73 = arith.addf %60, %72 : vector<2x8x8xf32>
    %cst_30 = arith.constant dense<0xFF800000> : vector<2x8xf32>
    %74 = vector.multi_reduction <maximumf>, %73, %cst_30 [2] : vector<2x8x8xf32> to vector<2x8xf32>
    %75 = vector.shape_cast %74 : vector<2x8xf32> to vector<2x8x1xf32>
    %76 = vector.broadcast %75 : vector<2x8x1xf32> to vector<2x8x8xf32>
    %77 = arith.subf %73, %76 : vector<2x8x8xf32>
    %78 = math.exp %77 : vector<2x8x8xf32>
    %cst_31 = arith.constant dense<0.000000e+00> : vector<2x8xf32>
    %79 = vector.multi_reduction <add>, %78, %cst_31 [2] : vector<2x8x8xf32> to vector<2x8xf32>
    %80 = vector.shape_cast %79 : vector<2x8xf32> to vector<2x8x1xf32>
    %81 = math.log %80 : vector<2x8x1xf32>
    %82 = arith.addf %75, %81 : vector<2x8x1xf32>
    %83 = arith.subf %64, %82 : vector<2x8x1xf32>
    %84 = vector.broadcast %83 : vector<2x8x1xf32> to vector<2x8x8xf32>
    %85 = arith.addf %60, %84 : vector<2x8x8xf32>
    %cst_32 = arith.constant dense<0xFF800000> : vector<2x8xf32>
    %86 = vector.multi_reduction <maximumf>, %85, %cst_32 [1] : vector<2x8x8xf32> to vector<2x8xf32>
    %87 = vector.shape_cast %86 : vector<2x8xf32> to vector<2x1x8xf32>
    %88 = vector.broadcast %87 : vector<2x1x8xf32> to vector<2x8x8xf32>
    %89 = arith.subf %85, %88 : vector<2x8x8xf32>
    %90 = math.exp %89 : vector<2x8x8xf32>
    %cst_33 = arith.constant dense<0.000000e+00> : vector<2x8xf32>
    %91 = vector.multi_reduction <add>, %90, %cst_33 [1] : vector<2x8x8xf32> to vector<2x8xf32>
    %92 = vector.shape_cast %91 : vector<2x8xf32> to vector<2x1x8xf32>
    %93 = math.log %92 : vector<2x1x8xf32>
    %94 = arith.addf %87, %93 : vector<2x1x8xf32>
    %95 = arith.subf %68, %94 : vector<2x1x8xf32>
    %96 = arith.subf %83, %69 : vector<2x8x1xf32>
    %97 = math.absf %96 : vector<2x8x1xf32>
    %98 = vector.shape_cast %97 : vector<2x8x1xf32> to vector<1x2x8x1xf32>
    %cst_34 = arith.constant dense<0.000000e+00> : vector<1xf32>
    %99 = vector.multi_reduction <add>, %98, %cst_34 [1, 2, 3] : vector<1x2x8x1xf32> to vector<1xf32>
    %100 = vector.shape_cast %99 : vector<1xf32> to vector<1x1x1x1xf32>
    %101 = vector.extract %100[0, 0, 0, 0] : f32 from vector<1x1x1x1xf32>
    %102 = vector.broadcast %101 : f32 to vector<1x1x1xf32>
    %cst_35 = arith.constant 5.000000e-04 : f32
    %103 = vector.broadcast %cst_35 : f32 to vector<1x1x1xf32>
    %104 = arith.mulf %103, %102 : vector<1x1x1xf32>
    %cst_36 = arith.constant 0.000000e+00 : f32
    %105 = vector.broadcast %cst_36 : f32 to vector<1x1x1xf32>
    %106 = arith.cmpf ogt, %71, %105 : vector<1x1x1xf32>
    %107 = vector.shape_cast %106 : vector<1x1x1xi1> to vector<1x1x1xi1>
    %108 = vector.broadcast %107 : vector<1x1x1xi1> to vector<2x8x1xi1>
    %109 = arith.select %108, %69, %83 : vector<2x8x1xi1>, vector<2x8x1xf32>
    %110 = vector.shape_cast %106 : vector<1x1x1xi1> to vector<1x1x1xi1>
    %111 = vector.broadcast %110 : vector<1x1x1xi1> to vector<2x1x8xi1>
    %112 = arith.select %111, %70, %95 : vector<2x1x8xi1>, vector<2x1x8xf32>
    %cst_37 = arith.constant 1.000000e-01 : f32
    %113 = vector.broadcast %cst_37 : f32 to vector<1x1x1xf32>
    %114 = arith.cmpf olt, %104, %113 : vector<1x1x1xf32>
    %115 = arith.extui %114 : vector<1x1x1xi1> to vector<1x1x1xi32>
    %116 = arith.sitofp %115 : vector<1x1x1xi32> to vector<1x1x1xf32>
    %117 = arith.maximumf %71, %116 : vector<1x1x1xf32>
    %c1_i32 = arith.constant 1 : i32
    %118 = vector.broadcast %112 : vector<2x1x8xf32> to vector<2x8x8xf32>
    %119 = arith.addf %60, %118 : vector<2x8x8xf32>
    %cst_38 = arith.constant dense<0xFF800000> : vector<2x8xf32>
    %120 = vector.multi_reduction <maximumf>, %119, %cst_38 [2] : vector<2x8x8xf32> to vector<2x8xf32>
    %121 = vector.shape_cast %120 : vector<2x8xf32> to vector<2x8x1xf32>
    %122 = vector.broadcast %121 : vector<2x8x1xf32> to vector<2x8x8xf32>
    %123 = arith.subf %119, %122 : vector<2x8x8xf32>
    %124 = math.exp %123 : vector<2x8x8xf32>
    %cst_39 = arith.constant dense<0.000000e+00> : vector<2x8xf32>
    %125 = vector.multi_reduction <add>, %124, %cst_39 [2] : vector<2x8x8xf32> to vector<2x8xf32>
    %126 = vector.shape_cast %125 : vector<2x8xf32> to vector<2x8x1xf32>
    %127 = math.log %126 : vector<2x8x1xf32>
    %128 = arith.addf %121, %127 : vector<2x8x1xf32>
    %129 = arith.subf %64, %128 : vector<2x8x1xf32>
    %130 = vector.broadcast %129 : vector<2x8x1xf32> to vector<2x8x8xf32>
    %131 = arith.addf %60, %130 : vector<2x8x8xf32>
    %cst_40 = arith.constant dense<0xFF800000> : vector<2x8xf32>
    %132 = vector.multi_reduction <maximumf>, %131, %cst_40 [1] : vector<2x8x8xf32> to vector<2x8xf32>
    %133 = vector.shape_cast %132 : vector<2x8xf32> to vector<2x1x8xf32>
    %134 = vector.broadcast %133 : vector<2x1x8xf32> to vector<2x8x8xf32>
    %135 = arith.subf %131, %134 : vector<2x8x8xf32>
    %136 = math.exp %135 : vector<2x8x8xf32>
    %cst_41 = arith.constant dense<0.000000e+00> : vector<2x8xf32>
    %137 = vector.multi_reduction <add>, %136, %cst_41 [1] : vector<2x8x8xf32> to vector<2x8xf32>
    %138 = vector.shape_cast %137 : vector<2x8xf32> to vector<2x1x8xf32>
    %139 = math.log %138 : vector<2x1x8xf32>
    %140 = arith.addf %133, %139 : vector<2x1x8xf32>
    %141 = arith.subf %68, %140 : vector<2x1x8xf32>
    %142 = arith.subf %129, %109 : vector<2x8x1xf32>
    %143 = math.absf %142 : vector<2x8x1xf32>
    %144 = vector.shape_cast %143 : vector<2x8x1xf32> to vector<1x2x8x1xf32>
    %cst_42 = arith.constant dense<0.000000e+00> : vector<1xf32>
    %145 = vector.multi_reduction <add>, %144, %cst_42 [1, 2, 3] : vector<1x2x8x1xf32> to vector<1xf32>
    %146 = vector.shape_cast %145 : vector<1xf32> to vector<1x1x1x1xf32>
    %147 = vector.extract %146[0, 0, 0, 0] : f32 from vector<1x1x1x1xf32>
    %148 = vector.broadcast %147 : f32 to vector<1x1x1xf32>
    %cst_43 = arith.constant 5.000000e-04 : f32
    %149 = vector.broadcast %cst_43 : f32 to vector<1x1x1xf32>
    %150 = arith.mulf %149, %148 : vector<1x1x1xf32>
    %cst_44 = arith.constant 0.000000e+00 : f32
    %151 = vector.broadcast %cst_44 : f32 to vector<1x1x1xf32>
    %152 = arith.cmpf ogt, %117, %151 : vector<1x1x1xf32>
    %153 = vector.shape_cast %152 : vector<1x1x1xi1> to vector<1x1x1xi1>
    %154 = vector.broadcast %153 : vector<1x1x1xi1> to vector<2x8x1xi1>
    %155 = arith.select %154, %109, %129 : vector<2x8x1xi1>, vector<2x8x1xf32>
    %156 = vector.shape_cast %152 : vector<1x1x1xi1> to vector<1x1x1xi1>
    %157 = vector.broadcast %156 : vector<1x1x1xi1> to vector<2x1x8xi1>
    %158 = arith.select %157, %112, %141 : vector<2x1x8xi1>, vector<2x1x8xf32>
    %cst_45 = arith.constant 1.000000e-01 : f32
    %159 = vector.broadcast %cst_45 : f32 to vector<1x1x1xf32>
    %160 = arith.cmpf olt, %150, %159 : vector<1x1x1xf32>
    %161 = arith.extui %160 : vector<1x1x1xi1> to vector<1x1x1xi32>
    %162 = arith.sitofp %161 : vector<1x1x1xi32> to vector<1x1x1xf32>
    %163 = arith.maximumf %117, %162 : vector<1x1x1xf32>
    %c2_i32 = arith.constant 2 : i32
    %164 = vector.broadcast %158 : vector<2x1x8xf32> to vector<2x8x8xf32>
    %165 = arith.addf %60, %164 : vector<2x8x8xf32>
    %cst_46 = arith.constant dense<0xFF800000> : vector<2x8xf32>
    %166 = vector.multi_reduction <maximumf>, %165, %cst_46 [2] : vector<2x8x8xf32> to vector<2x8xf32>
    %167 = vector.shape_cast %166 : vector<2x8xf32> to vector<2x8x1xf32>
    %168 = vector.broadcast %167 : vector<2x8x1xf32> to vector<2x8x8xf32>
    %169 = arith.subf %165, %168 : vector<2x8x8xf32>
    %170 = math.exp %169 : vector<2x8x8xf32>
    %cst_47 = arith.constant dense<0.000000e+00> : vector<2x8xf32>
    %171 = vector.multi_reduction <add>, %170, %cst_47 [2] : vector<2x8x8xf32> to vector<2x8xf32>
    %172 = vector.shape_cast %171 : vector<2x8xf32> to vector<2x8x1xf32>
    %173 = math.log %172 : vector<2x8x1xf32>
    %174 = arith.addf %167, %173 : vector<2x8x1xf32>
    %175 = arith.subf %64, %174 : vector<2x8x1xf32>
    %176 = vector.broadcast %175 : vector<2x8x1xf32> to vector<2x8x8xf32>
    %177 = arith.addf %60, %176 : vector<2x8x8xf32>
    %cst_48 = arith.constant dense<0xFF800000> : vector<2x8xf32>
    %178 = vector.multi_reduction <maximumf>, %177, %cst_48 [1] : vector<2x8x8xf32> to vector<2x8xf32>
    %179 = vector.shape_cast %178 : vector<2x8xf32> to vector<2x1x8xf32>
    %180 = vector.broadcast %179 : vector<2x1x8xf32> to vector<2x8x8xf32>
    %181 = arith.subf %177, %180 : vector<2x8x8xf32>
    %182 = math.exp %181 : vector<2x8x8xf32>
    %cst_49 = arith.constant dense<0.000000e+00> : vector<2x8xf32>
    %183 = vector.multi_reduction <add>, %182, %cst_49 [1] : vector<2x8x8xf32> to vector<2x8xf32>
    %184 = vector.shape_cast %183 : vector<2x8xf32> to vector<2x1x8xf32>
    %185 = math.log %184 : vector<2x1x8xf32>
    %186 = arith.addf %179, %185 : vector<2x1x8xf32>
    %187 = arith.subf %68, %186 : vector<2x1x8xf32>
    %188 = arith.subf %175, %155 : vector<2x8x1xf32>
    %189 = math.absf %188 : vector<2x8x1xf32>
    %190 = vector.shape_cast %189 : vector<2x8x1xf32> to vector<1x2x8x1xf32>
    %cst_50 = arith.constant dense<0.000000e+00> : vector<1xf32>
    %191 = vector.multi_reduction <add>, %190, %cst_50 [1, 2, 3] : vector<1x2x8x1xf32> to vector<1xf32>
    %192 = vector.shape_cast %191 : vector<1xf32> to vector<1x1x1x1xf32>
    %193 = vector.extract %192[0, 0, 0, 0] : f32 from vector<1x1x1x1xf32>
    %194 = vector.broadcast %193 : f32 to vector<1x1x1xf32>
    %cst_51 = arith.constant 5.000000e-04 : f32
    %195 = vector.broadcast %cst_51 : f32 to vector<1x1x1xf32>
    %196 = arith.mulf %195, %194 : vector<1x1x1xf32>
    %cst_52 = arith.constant 0.000000e+00 : f32
    %197 = vector.broadcast %cst_52 : f32 to vector<1x1x1xf32>
    %198 = arith.cmpf ogt, %163, %197 : vector<1x1x1xf32>
    %199 = vector.shape_cast %198 : vector<1x1x1xi1> to vector<1x1x1xi1>
    %200 = vector.broadcast %199 : vector<1x1x1xi1> to vector<2x8x1xi1>
    %201 = arith.select %200, %155, %175 : vector<2x8x1xi1>, vector<2x8x1xf32>
    %202 = vector.shape_cast %198 : vector<1x1x1xi1> to vector<1x1x1xi1>
    %203 = vector.broadcast %202 : vector<1x1x1xi1> to vector<2x1x8xi1>
    %204 = arith.select %203, %158, %187 : vector<2x1x8xi1>, vector<2x1x8xf32>
    %cst_53 = arith.constant 1.000000e-01 : f32
    %205 = vector.broadcast %cst_53 : f32 to vector<1x1x1xf32>
    %206 = arith.cmpf olt, %196, %205 : vector<1x1x1xf32>
    %207 = arith.extui %206 : vector<1x1x1xi1> to vector<1x1x1xi32>
    %208 = arith.sitofp %207 : vector<1x1x1xi32> to vector<1x1x1xf32>
    %209 = arith.maximumf %163, %208 : vector<1x1x1xf32>
    %c3_i32 = arith.constant 3 : i32
    %210 = vector.broadcast %204 : vector<2x1x8xf32> to vector<2x8x8xf32>
    %211 = arith.addf %60, %210 : vector<2x8x8xf32>
    %cst_54 = arith.constant dense<0xFF800000> : vector<2x8xf32>
    %212 = vector.multi_reduction <maximumf>, %211, %cst_54 [2] : vector<2x8x8xf32> to vector<2x8xf32>
    %213 = vector.shape_cast %212 : vector<2x8xf32> to vector<2x8x1xf32>
    %214 = vector.broadcast %213 : vector<2x8x1xf32> to vector<2x8x8xf32>
    %215 = arith.subf %211, %214 : vector<2x8x8xf32>
    %216 = math.exp %215 : vector<2x8x8xf32>
    %cst_55 = arith.constant dense<0.000000e+00> : vector<2x8xf32>
    %217 = vector.multi_reduction <add>, %216, %cst_55 [2] : vector<2x8x8xf32> to vector<2x8xf32>
    %218 = vector.shape_cast %217 : vector<2x8xf32> to vector<2x8x1xf32>
    %219 = math.log %218 : vector<2x8x1xf32>
    %220 = arith.addf %213, %219 : vector<2x8x1xf32>
    %221 = arith.subf %64, %220 : vector<2x8x1xf32>
    %222 = vector.broadcast %221 : vector<2x8x1xf32> to vector<2x8x8xf32>
    %223 = arith.addf %60, %222 : vector<2x8x8xf32>
    %cst_56 = arith.constant dense<0xFF800000> : vector<2x8xf32>
    %224 = vector.multi_reduction <maximumf>, %223, %cst_56 [1] : vector<2x8x8xf32> to vector<2x8xf32>
    %225 = vector.shape_cast %224 : vector<2x8xf32> to vector<2x1x8xf32>
    %226 = vector.broadcast %225 : vector<2x1x8xf32> to vector<2x8x8xf32>
    %227 = arith.subf %223, %226 : vector<2x8x8xf32>
    %228 = math.exp %227 : vector<2x8x8xf32>
    %cst_57 = arith.constant dense<0.000000e+00> : vector<2x8xf32>
    %229 = vector.multi_reduction <add>, %228, %cst_57 [1] : vector<2x8x8xf32> to vector<2x8xf32>
    %230 = vector.shape_cast %229 : vector<2x8xf32> to vector<2x1x8xf32>
    %231 = math.log %230 : vector<2x1x8xf32>
    %232 = arith.addf %225, %231 : vector<2x1x8xf32>
    %233 = arith.subf %68, %232 : vector<2x1x8xf32>
    %234 = arith.subf %221, %201 : vector<2x8x1xf32>
    %235 = math.absf %234 : vector<2x8x1xf32>
    %236 = vector.shape_cast %235 : vector<2x8x1xf32> to vector<1x2x8x1xf32>
    %cst_58 = arith.constant dense<0.000000e+00> : vector<1xf32>
    %237 = vector.multi_reduction <add>, %236, %cst_58 [1, 2, 3] : vector<1x2x8x1xf32> to vector<1xf32>
    %238 = vector.shape_cast %237 : vector<1xf32> to vector<1x1x1x1xf32>
    %239 = vector.extract %238[0, 0, 0, 0] : f32 from vector<1x1x1x1xf32>
    %240 = vector.broadcast %239 : f32 to vector<1x1x1xf32>
    %cst_59 = arith.constant 5.000000e-04 : f32
    %241 = vector.broadcast %cst_59 : f32 to vector<1x1x1xf32>
    %242 = arith.mulf %241, %240 : vector<1x1x1xf32>
    %cst_60 = arith.constant 0.000000e+00 : f32
    %243 = vector.broadcast %cst_60 : f32 to vector<1x1x1xf32>
    %244 = arith.cmpf ogt, %209, %243 : vector<1x1x1xf32>
    %245 = vector.shape_cast %244 : vector<1x1x1xi1> to vector<1x1x1xi1>
    %246 = vector.broadcast %245 : vector<1x1x1xi1> to vector<2x8x1xi1>
    %247 = arith.select %246, %201, %221 : vector<2x8x1xi1>, vector<2x8x1xf32>
    %248 = vector.shape_cast %244 : vector<1x1x1xi1> to vector<1x1x1xi1>
    %249 = vector.broadcast %248 : vector<1x1x1xi1> to vector<2x1x8xi1>
    %250 = arith.select %249, %204, %233 : vector<2x1x8xi1>, vector<2x1x8xf32>
    %cst_61 = arith.constant 1.000000e-01 : f32
    %251 = vector.broadcast %cst_61 : f32 to vector<1x1x1xf32>
    %252 = arith.cmpf olt, %242, %251 : vector<1x1x1xf32>
    %253 = arith.extui %252 : vector<1x1x1xi1> to vector<1x1x1xi32>
    %254 = arith.sitofp %253 : vector<1x1x1xi32> to vector<1x1x1xf32>
    %255 = arith.maximumf %209, %254 : vector<1x1x1xf32>
    %c4_i32 = arith.constant 4 : i32
    %256 = vector.broadcast %250 : vector<2x1x8xf32> to vector<2x8x8xf32>
    %257 = arith.addf %60, %256 : vector<2x8x8xf32>
    %cst_62 = arith.constant dense<0xFF800000> : vector<2x8xf32>
    %258 = vector.multi_reduction <maximumf>, %257, %cst_62 [2] : vector<2x8x8xf32> to vector<2x8xf32>
    %259 = vector.shape_cast %258 : vector<2x8xf32> to vector<2x8x1xf32>
    %260 = vector.broadcast %259 : vector<2x8x1xf32> to vector<2x8x8xf32>
    %261 = arith.subf %257, %260 : vector<2x8x8xf32>
    %262 = math.exp %261 : vector<2x8x8xf32>
    %cst_63 = arith.constant dense<0.000000e+00> : vector<2x8xf32>
    %263 = vector.multi_reduction <add>, %262, %cst_63 [2] : vector<2x8x8xf32> to vector<2x8xf32>
    %264 = vector.shape_cast %263 : vector<2x8xf32> to vector<2x8x1xf32>
    %265 = math.log %264 : vector<2x8x1xf32>
    %266 = arith.addf %259, %265 : vector<2x8x1xf32>
    %267 = arith.subf %64, %266 : vector<2x8x1xf32>
    %268 = vector.broadcast %267 : vector<2x8x1xf32> to vector<2x8x8xf32>
    %269 = arith.addf %60, %268 : vector<2x8x8xf32>
    %cst_64 = arith.constant dense<0xFF800000> : vector<2x8xf32>
    %270 = vector.multi_reduction <maximumf>, %269, %cst_64 [1] : vector<2x8x8xf32> to vector<2x8xf32>
    %271 = vector.shape_cast %270 : vector<2x8xf32> to vector<2x1x8xf32>
    %272 = vector.broadcast %271 : vector<2x1x8xf32> to vector<2x8x8xf32>
    %273 = arith.subf %269, %272 : vector<2x8x8xf32>
    %274 = math.exp %273 : vector<2x8x8xf32>
    %cst_65 = arith.constant dense<0.000000e+00> : vector<2x8xf32>
    %275 = vector.multi_reduction <add>, %274, %cst_65 [1] : vector<2x8x8xf32> to vector<2x8xf32>
    %276 = vector.shape_cast %275 : vector<2x8xf32> to vector<2x1x8xf32>
    %277 = math.log %276 : vector<2x1x8xf32>
    %278 = arith.addf %271, %277 : vector<2x1x8xf32>
    %279 = arith.subf %68, %278 : vector<2x1x8xf32>
    %280 = arith.subf %267, %247 : vector<2x8x1xf32>
    %281 = math.absf %280 : vector<2x8x1xf32>
    %282 = vector.shape_cast %281 : vector<2x8x1xf32> to vector<1x2x8x1xf32>
    %cst_66 = arith.constant dense<0.000000e+00> : vector<1xf32>
    %283 = vector.multi_reduction <add>, %282, %cst_66 [1, 2, 3] : vector<1x2x8x1xf32> to vector<1xf32>
    %284 = vector.shape_cast %283 : vector<1xf32> to vector<1x1x1x1xf32>
    %285 = vector.extract %284[0, 0, 0, 0] : f32 from vector<1x1x1x1xf32>
    %286 = vector.broadcast %285 : f32 to vector<1x1x1xf32>
    %cst_67 = arith.constant 5.000000e-04 : f32
    %287 = vector.broadcast %cst_67 : f32 to vector<1x1x1xf32>
    %288 = arith.mulf %287, %286 : vector<1x1x1xf32>
    %cst_68 = arith.constant 0.000000e+00 : f32
    %289 = vector.broadcast %cst_68 : f32 to vector<1x1x1xf32>
    %290 = arith.cmpf ogt, %255, %289 : vector<1x1x1xf32>
    %291 = vector.shape_cast %290 : vector<1x1x1xi1> to vector<1x1x1xi1>
    %292 = vector.broadcast %291 : vector<1x1x1xi1> to vector<2x8x1xi1>
    %293 = arith.select %292, %247, %267 : vector<2x8x1xi1>, vector<2x8x1xf32>
    %294 = vector.shape_cast %290 : vector<1x1x1xi1> to vector<1x1x1xi1>
    %295 = vector.broadcast %294 : vector<1x1x1xi1> to vector<2x1x8xi1>
    %296 = arith.select %295, %250, %279 : vector<2x1x8xi1>, vector<2x1x8xf32>
    %cst_69 = arith.constant 1.000000e-01 : f32
    %297 = vector.broadcast %cst_69 : f32 to vector<1x1x1xf32>
    %298 = arith.cmpf olt, %288, %297 : vector<1x1x1xf32>
    %299 = arith.extui %298 : vector<1x1x1xi1> to vector<1x1x1xi32>
    %300 = arith.sitofp %299 : vector<1x1x1xi32> to vector<1x1x1xf32>
    %301 = arith.maximumf %255, %300 : vector<1x1x1xf32>
    %c5_i32 = arith.constant 5 : i32
    %302 = vector.broadcast %296 : vector<2x1x8xf32> to vector<2x8x8xf32>
    %303 = arith.addf %60, %302 : vector<2x8x8xf32>
    %cst_70 = arith.constant dense<0xFF800000> : vector<2x8xf32>
    %304 = vector.multi_reduction <maximumf>, %303, %cst_70 [2] : vector<2x8x8xf32> to vector<2x8xf32>
    %305 = vector.shape_cast %304 : vector<2x8xf32> to vector<2x8x1xf32>
    %306 = vector.broadcast %305 : vector<2x8x1xf32> to vector<2x8x8xf32>
    %307 = arith.subf %303, %306 : vector<2x8x8xf32>
    %308 = math.exp %307 : vector<2x8x8xf32>
    %cst_71 = arith.constant dense<0.000000e+00> : vector<2x8xf32>
    %309 = vector.multi_reduction <add>, %308, %cst_71 [2] : vector<2x8x8xf32> to vector<2x8xf32>
    %310 = vector.shape_cast %309 : vector<2x8xf32> to vector<2x8x1xf32>
    %311 = math.log %310 : vector<2x8x1xf32>
    %312 = arith.addf %305, %311 : vector<2x8x1xf32>
    %313 = arith.subf %64, %312 : vector<2x8x1xf32>
    %314 = vector.broadcast %313 : vector<2x8x1xf32> to vector<2x8x8xf32>
    %315 = arith.addf %60, %314 : vector<2x8x8xf32>
    %cst_72 = arith.constant dense<0xFF800000> : vector<2x8xf32>
    %316 = vector.multi_reduction <maximumf>, %315, %cst_72 [1] : vector<2x8x8xf32> to vector<2x8xf32>
    %317 = vector.shape_cast %316 : vector<2x8xf32> to vector<2x1x8xf32>
    %318 = vector.broadcast %317 : vector<2x1x8xf32> to vector<2x8x8xf32>
    %319 = arith.subf %315, %318 : vector<2x8x8xf32>
    %320 = math.exp %319 : vector<2x8x8xf32>
    %cst_73 = arith.constant dense<0.000000e+00> : vector<2x8xf32>
    %321 = vector.multi_reduction <add>, %320, %cst_73 [1] : vector<2x8x8xf32> to vector<2x8xf32>
    %322 = vector.shape_cast %321 : vector<2x8xf32> to vector<2x1x8xf32>
    %323 = math.log %322 : vector<2x1x8xf32>
    %324 = arith.addf %317, %323 : vector<2x1x8xf32>
    %325 = arith.subf %68, %324 : vector<2x1x8xf32>
    %326 = arith.subf %313, %293 : vector<2x8x1xf32>
    %327 = math.absf %326 : vector<2x8x1xf32>
    %328 = vector.shape_cast %327 : vector<2x8x1xf32> to vector<1x2x8x1xf32>
    %cst_74 = arith.constant dense<0.000000e+00> : vector<1xf32>
    %329 = vector.multi_reduction <add>, %328, %cst_74 [1, 2, 3] : vector<1x2x8x1xf32> to vector<1xf32>
    %330 = vector.shape_cast %329 : vector<1xf32> to vector<1x1x1x1xf32>
    %331 = vector.extract %330[0, 0, 0, 0] : f32 from vector<1x1x1x1xf32>
    %332 = vector.broadcast %331 : f32 to vector<1x1x1xf32>
    %cst_75 = arith.constant 5.000000e-04 : f32
    %333 = vector.broadcast %cst_75 : f32 to vector<1x1x1xf32>
    %334 = arith.mulf %333, %332 : vector<1x1x1xf32>
    %cst_76 = arith.constant 0.000000e+00 : f32
    %335 = vector.broadcast %cst_76 : f32 to vector<1x1x1xf32>
    %336 = arith.cmpf ogt, %301, %335 : vector<1x1x1xf32>
    %337 = vector.shape_cast %336 : vector<1x1x1xi1> to vector<1x1x1xi1>
    %338 = vector.broadcast %337 : vector<1x1x1xi1> to vector<2x8x1xi1>
    %339 = arith.select %338, %293, %313 : vector<2x8x1xi1>, vector<2x8x1xf32>
    %340 = vector.shape_cast %336 : vector<1x1x1xi1> to vector<1x1x1xi1>
    %341 = vector.broadcast %340 : vector<1x1x1xi1> to vector<2x1x8xi1>
    %342 = arith.select %341, %296, %325 : vector<2x1x8xi1>, vector<2x1x8xf32>
    %cst_77 = arith.constant 1.000000e-01 : f32
    %343 = vector.broadcast %cst_77 : f32 to vector<1x1x1xf32>
    %344 = arith.cmpf olt, %334, %343 : vector<1x1x1xf32>
    %345 = arith.extui %344 : vector<1x1x1xi1> to vector<1x1x1xi32>
    %346 = arith.sitofp %345 : vector<1x1x1xi32> to vector<1x1x1xf32>
    %347 = arith.maximumf %301, %346 : vector<1x1x1xf32>
    %c6_i32 = arith.constant 6 : i32
    %348 = vector.broadcast %342 : vector<2x1x8xf32> to vector<2x8x8xf32>
    %349 = arith.addf %60, %348 : vector<2x8x8xf32>
    %cst_78 = arith.constant dense<0xFF800000> : vector<2x8xf32>
    %350 = vector.multi_reduction <maximumf>, %349, %cst_78 [2] : vector<2x8x8xf32> to vector<2x8xf32>
    %351 = vector.shape_cast %350 : vector<2x8xf32> to vector<2x8x1xf32>
    %352 = vector.broadcast %351 : vector<2x8x1xf32> to vector<2x8x8xf32>
    %353 = arith.subf %349, %352 : vector<2x8x8xf32>
    %354 = math.exp %353 : vector<2x8x8xf32>
    %cst_79 = arith.constant dense<0.000000e+00> : vector<2x8xf32>
    %355 = vector.multi_reduction <add>, %354, %cst_79 [2] : vector<2x8x8xf32> to vector<2x8xf32>
    %356 = vector.shape_cast %355 : vector<2x8xf32> to vector<2x8x1xf32>
    %357 = math.log %356 : vector<2x8x1xf32>
    %358 = arith.addf %351, %357 : vector<2x8x1xf32>
    %359 = arith.subf %64, %358 : vector<2x8x1xf32>
    %360 = vector.broadcast %359 : vector<2x8x1xf32> to vector<2x8x8xf32>
    %361 = arith.addf %60, %360 : vector<2x8x8xf32>
    %cst_80 = arith.constant dense<0xFF800000> : vector<2x8xf32>
    %362 = vector.multi_reduction <maximumf>, %361, %cst_80 [1] : vector<2x8x8xf32> to vector<2x8xf32>
    %363 = vector.shape_cast %362 : vector<2x8xf32> to vector<2x1x8xf32>
    %364 = vector.broadcast %363 : vector<2x1x8xf32> to vector<2x8x8xf32>
    %365 = arith.subf %361, %364 : vector<2x8x8xf32>
    %366 = math.exp %365 : vector<2x8x8xf32>
    %cst_81 = arith.constant dense<0.000000e+00> : vector<2x8xf32>
    %367 = vector.multi_reduction <add>, %366, %cst_81 [1] : vector<2x8x8xf32> to vector<2x8xf32>
    %368 = vector.shape_cast %367 : vector<2x8xf32> to vector<2x1x8xf32>
    %369 = math.log %368 : vector<2x1x8xf32>
    %370 = arith.addf %363, %369 : vector<2x1x8xf32>
    %371 = arith.subf %68, %370 : vector<2x1x8xf32>
    %372 = arith.subf %359, %339 : vector<2x8x1xf32>
    %373 = math.absf %372 : vector<2x8x1xf32>
    %374 = vector.shape_cast %373 : vector<2x8x1xf32> to vector<1x2x8x1xf32>
    %cst_82 = arith.constant dense<0.000000e+00> : vector<1xf32>
    %375 = vector.multi_reduction <add>, %374, %cst_82 [1, 2, 3] : vector<1x2x8x1xf32> to vector<1xf32>
    %376 = vector.shape_cast %375 : vector<1xf32> to vector<1x1x1x1xf32>
    %377 = vector.extract %376[0, 0, 0, 0] : f32 from vector<1x1x1x1xf32>
    %378 = vector.broadcast %377 : f32 to vector<1x1x1xf32>
    %cst_83 = arith.constant 5.000000e-04 : f32
    %379 = vector.broadcast %cst_83 : f32 to vector<1x1x1xf32>
    %380 = arith.mulf %379, %378 : vector<1x1x1xf32>
    %cst_84 = arith.constant 0.000000e+00 : f32
    %381 = vector.broadcast %cst_84 : f32 to vector<1x1x1xf32>
    %382 = arith.cmpf ogt, %347, %381 : vector<1x1x1xf32>
    %383 = vector.shape_cast %382 : vector<1x1x1xi1> to vector<1x1x1xi1>
    %384 = vector.broadcast %383 : vector<1x1x1xi1> to vector<2x8x1xi1>
    %385 = arith.select %384, %339, %359 : vector<2x8x1xi1>, vector<2x8x1xf32>
    %386 = vector.shape_cast %382 : vector<1x1x1xi1> to vector<1x1x1xi1>
    %387 = vector.broadcast %386 : vector<1x1x1xi1> to vector<2x1x8xi1>
    %388 = arith.select %387, %342, %371 : vector<2x1x8xi1>, vector<2x1x8xf32>
    %cst_85 = arith.constant 1.000000e-01 : f32
    %389 = vector.broadcast %cst_85 : f32 to vector<1x1x1xf32>
    %390 = arith.cmpf olt, %380, %389 : vector<1x1x1xf32>
    %391 = arith.extui %390 : vector<1x1x1xi1> to vector<1x1x1xi32>
    %392 = arith.sitofp %391 : vector<1x1x1xi32> to vector<1x1x1xf32>
    %393 = arith.maximumf %347, %392 : vector<1x1x1xf32>
    %c7_i32 = arith.constant 7 : i32
    %394 = vector.broadcast %388 : vector<2x1x8xf32> to vector<2x8x8xf32>
    %395 = arith.addf %60, %394 : vector<2x8x8xf32>
    %cst_86 = arith.constant dense<0xFF800000> : vector<2x8xf32>
    %396 = vector.multi_reduction <maximumf>, %395, %cst_86 [2] : vector<2x8x8xf32> to vector<2x8xf32>
    %397 = vector.shape_cast %396 : vector<2x8xf32> to vector<2x8x1xf32>
    %398 = vector.broadcast %397 : vector<2x8x1xf32> to vector<2x8x8xf32>
    %399 = arith.subf %395, %398 : vector<2x8x8xf32>
    %400 = math.exp %399 : vector<2x8x8xf32>
    %cst_87 = arith.constant dense<0.000000e+00> : vector<2x8xf32>
    %401 = vector.multi_reduction <add>, %400, %cst_87 [2] : vector<2x8x8xf32> to vector<2x8xf32>
    %402 = vector.shape_cast %401 : vector<2x8xf32> to vector<2x8x1xf32>
    %403 = math.log %402 : vector<2x8x1xf32>
    %404 = arith.addf %397, %403 : vector<2x8x1xf32>
    %405 = arith.subf %64, %404 : vector<2x8x1xf32>
    %406 = vector.broadcast %405 : vector<2x8x1xf32> to vector<2x8x8xf32>
    %407 = arith.addf %60, %406 : vector<2x8x8xf32>
    %cst_88 = arith.constant dense<0xFF800000> : vector<2x8xf32>
    %408 = vector.multi_reduction <maximumf>, %407, %cst_88 [1] : vector<2x8x8xf32> to vector<2x8xf32>
    %409 = vector.shape_cast %408 : vector<2x8xf32> to vector<2x1x8xf32>
    %410 = vector.broadcast %409 : vector<2x1x8xf32> to vector<2x8x8xf32>
    %411 = arith.subf %407, %410 : vector<2x8x8xf32>
    %412 = math.exp %411 : vector<2x8x8xf32>
    %cst_89 = arith.constant dense<0.000000e+00> : vector<2x8xf32>
    %413 = vector.multi_reduction <add>, %412, %cst_89 [1] : vector<2x8x8xf32> to vector<2x8xf32>
    %414 = vector.shape_cast %413 : vector<2x8xf32> to vector<2x1x8xf32>
    %415 = math.log %414 : vector<2x1x8xf32>
    %416 = arith.addf %409, %415 : vector<2x1x8xf32>
    %417 = arith.subf %68, %416 : vector<2x1x8xf32>
    %418 = arith.subf %405, %385 : vector<2x8x1xf32>
    %419 = math.absf %418 : vector<2x8x1xf32>
    %420 = vector.shape_cast %419 : vector<2x8x1xf32> to vector<1x2x8x1xf32>
    %cst_90 = arith.constant dense<0.000000e+00> : vector<1xf32>
    %421 = vector.multi_reduction <add>, %420, %cst_90 [1, 2, 3] : vector<1x2x8x1xf32> to vector<1xf32>
    %422 = vector.shape_cast %421 : vector<1xf32> to vector<1x1x1x1xf32>
    %423 = vector.extract %422[0, 0, 0, 0] : f32 from vector<1x1x1x1xf32>
    %424 = vector.broadcast %423 : f32 to vector<1x1x1xf32>
    %cst_91 = arith.constant 5.000000e-04 : f32
    %425 = vector.broadcast %cst_91 : f32 to vector<1x1x1xf32>
    %426 = arith.mulf %425, %424 : vector<1x1x1xf32>
    %cst_92 = arith.constant 0.000000e+00 : f32
    %427 = vector.broadcast %cst_92 : f32 to vector<1x1x1xf32>
    %428 = arith.cmpf ogt, %393, %427 : vector<1x1x1xf32>
    %429 = vector.shape_cast %428 : vector<1x1x1xi1> to vector<1x1x1xi1>
    %430 = vector.broadcast %429 : vector<1x1x1xi1> to vector<2x8x1xi1>
    %431 = arith.select %430, %385, %405 : vector<2x8x1xi1>, vector<2x8x1xf32>
    %432 = vector.shape_cast %428 : vector<1x1x1xi1> to vector<1x1x1xi1>
    %433 = vector.broadcast %432 : vector<1x1x1xi1> to vector<2x1x8xi1>
    %434 = arith.select %433, %388, %417 : vector<2x1x8xi1>, vector<2x1x8xf32>
    %cst_93 = arith.constant 1.000000e-01 : f32
    %435 = vector.broadcast %cst_93 : f32 to vector<1x1x1xf32>
    %436 = arith.cmpf olt, %426, %435 : vector<1x1x1xf32>
    %437 = arith.extui %436 : vector<1x1x1xi1> to vector<1x1x1xi32>
    %438 = arith.sitofp %437 : vector<1x1x1xi32> to vector<1x1x1xf32>
    %439 = arith.maximumf %393, %438 : vector<1x1x1xf32>
    %c8_i32 = arith.constant 8 : i32
    %440 = vector.broadcast %434 : vector<2x1x8xf32> to vector<2x8x8xf32>
    %441 = arith.addf %60, %440 : vector<2x8x8xf32>
    %cst_94 = arith.constant dense<0xFF800000> : vector<2x8xf32>
    %442 = vector.multi_reduction <maximumf>, %441, %cst_94 [2] : vector<2x8x8xf32> to vector<2x8xf32>
    %443 = vector.shape_cast %442 : vector<2x8xf32> to vector<2x8x1xf32>
    %444 = vector.broadcast %443 : vector<2x8x1xf32> to vector<2x8x8xf32>
    %445 = arith.subf %441, %444 : vector<2x8x8xf32>
    %446 = math.exp %445 : vector<2x8x8xf32>
    %cst_95 = arith.constant dense<0.000000e+00> : vector<2x8xf32>
    %447 = vector.multi_reduction <add>, %446, %cst_95 [2] : vector<2x8x8xf32> to vector<2x8xf32>
    %448 = vector.shape_cast %447 : vector<2x8xf32> to vector<2x8x1xf32>
    %449 = math.log %448 : vector<2x8x1xf32>
    %450 = arith.addf %443, %449 : vector<2x8x1xf32>
    %451 = arith.subf %64, %450 : vector<2x8x1xf32>
    %452 = vector.broadcast %451 : vector<2x8x1xf32> to vector<2x8x8xf32>
    %453 = arith.addf %60, %452 : vector<2x8x8xf32>
    %cst_96 = arith.constant dense<0xFF800000> : vector<2x8xf32>
    %454 = vector.multi_reduction <maximumf>, %453, %cst_96 [1] : vector<2x8x8xf32> to vector<2x8xf32>
    %455 = vector.shape_cast %454 : vector<2x8xf32> to vector<2x1x8xf32>
    %456 = vector.broadcast %455 : vector<2x1x8xf32> to vector<2x8x8xf32>
    %457 = arith.subf %453, %456 : vector<2x8x8xf32>
    %458 = math.exp %457 : vector<2x8x8xf32>
    %cst_97 = arith.constant dense<0.000000e+00> : vector<2x8xf32>
    %459 = vector.multi_reduction <add>, %458, %cst_97 [1] : vector<2x8x8xf32> to vector<2x8xf32>
    %460 = vector.shape_cast %459 : vector<2x8xf32> to vector<2x1x8xf32>
    %461 = math.log %460 : vector<2x1x8xf32>
    %462 = arith.addf %455, %461 : vector<2x1x8xf32>
    %463 = arith.subf %68, %462 : vector<2x1x8xf32>
    %464 = arith.subf %451, %431 : vector<2x8x1xf32>
    %465 = math.absf %464 : vector<2x8x1xf32>
    %466 = vector.shape_cast %465 : vector<2x8x1xf32> to vector<1x2x8x1xf32>
    %cst_98 = arith.constant dense<0.000000e+00> : vector<1xf32>
    %467 = vector.multi_reduction <add>, %466, %cst_98 [1, 2, 3] : vector<1x2x8x1xf32> to vector<1xf32>
    %468 = vector.shape_cast %467 : vector<1xf32> to vector<1x1x1x1xf32>
    %469 = vector.extract %468[0, 0, 0, 0] : f32 from vector<1x1x1x1xf32>
    %470 = vector.broadcast %469 : f32 to vector<1x1x1xf32>
    %cst_99 = arith.constant 5.000000e-04 : f32
    %471 = vector.broadcast %cst_99 : f32 to vector<1x1x1xf32>
    %472 = arith.mulf %471, %470 : vector<1x1x1xf32>
    %cst_100 = arith.constant 0.000000e+00 : f32
    %473 = vector.broadcast %cst_100 : f32 to vector<1x1x1xf32>
    %474 = arith.cmpf ogt, %439, %473 : vector<1x1x1xf32>
    %475 = vector.shape_cast %474 : vector<1x1x1xi1> to vector<1x1x1xi1>
    %476 = vector.broadcast %475 : vector<1x1x1xi1> to vector<2x8x1xi1>
    %477 = arith.select %476, %431, %451 : vector<2x8x1xi1>, vector<2x8x1xf32>
    %478 = vector.shape_cast %474 : vector<1x1x1xi1> to vector<1x1x1xi1>
    %479 = vector.broadcast %478 : vector<1x1x1xi1> to vector<2x1x8xi1>
    %480 = arith.select %479, %434, %463 : vector<2x1x8xi1>, vector<2x1x8xf32>
    %cst_101 = arith.constant 1.000000e-01 : f32
    %481 = vector.broadcast %cst_101 : f32 to vector<1x1x1xf32>
    %482 = arith.cmpf olt, %472, %481 : vector<1x1x1xf32>
    %483 = arith.extui %482 : vector<1x1x1xi1> to vector<1x1x1xi32>
    %484 = arith.sitofp %483 : vector<1x1x1xi32> to vector<1x1x1xf32>
    %485 = arith.maximumf %439, %484 : vector<1x1x1xf32>
    %c9_i32 = arith.constant 9 : i32
    %486 = vector.broadcast %480 : vector<2x1x8xf32> to vector<2x8x8xf32>
    %487 = arith.addf %60, %486 : vector<2x8x8xf32>
    %cst_102 = arith.constant dense<0xFF800000> : vector<2x8xf32>
    %488 = vector.multi_reduction <maximumf>, %487, %cst_102 [2] : vector<2x8x8xf32> to vector<2x8xf32>
    %489 = vector.shape_cast %488 : vector<2x8xf32> to vector<2x8x1xf32>
    %490 = vector.broadcast %489 : vector<2x8x1xf32> to vector<2x8x8xf32>
    %491 = arith.subf %487, %490 : vector<2x8x8xf32>
    %492 = math.exp %491 : vector<2x8x8xf32>
    %cst_103 = arith.constant dense<0.000000e+00> : vector<2x8xf32>
    %493 = vector.multi_reduction <add>, %492, %cst_103 [2] : vector<2x8x8xf32> to vector<2x8xf32>
    %494 = vector.shape_cast %493 : vector<2x8xf32> to vector<2x8x1xf32>
    %495 = math.log %494 : vector<2x8x1xf32>
    %496 = arith.addf %489, %495 : vector<2x8x1xf32>
    %497 = arith.subf %64, %496 : vector<2x8x1xf32>
    %498 = vector.broadcast %497 : vector<2x8x1xf32> to vector<2x8x8xf32>
    %499 = arith.addf %60, %498 : vector<2x8x8xf32>
    %cst_104 = arith.constant dense<0xFF800000> : vector<2x8xf32>
    %500 = vector.multi_reduction <maximumf>, %499, %cst_104 [1] : vector<2x8x8xf32> to vector<2x8xf32>
    %501 = vector.shape_cast %500 : vector<2x8xf32> to vector<2x1x8xf32>
    %502 = vector.broadcast %501 : vector<2x1x8xf32> to vector<2x8x8xf32>
    %503 = arith.subf %499, %502 : vector<2x8x8xf32>
    %504 = math.exp %503 : vector<2x8x8xf32>
    %cst_105 = arith.constant dense<0.000000e+00> : vector<2x8xf32>
    %505 = vector.multi_reduction <add>, %504, %cst_105 [1] : vector<2x8x8xf32> to vector<2x8xf32>
    %506 = vector.shape_cast %505 : vector<2x8xf32> to vector<2x1x8xf32>
    %507 = math.log %506 : vector<2x1x8xf32>
    %508 = arith.addf %501, %507 : vector<2x1x8xf32>
    %509 = arith.subf %68, %508 : vector<2x1x8xf32>
    %510 = arith.subf %497, %477 : vector<2x8x1xf32>
    %511 = math.absf %510 : vector<2x8x1xf32>
    %512 = vector.shape_cast %511 : vector<2x8x1xf32> to vector<1x2x8x1xf32>
    %cst_106 = arith.constant dense<0.000000e+00> : vector<1xf32>
    %513 = vector.multi_reduction <add>, %512, %cst_106 [1, 2, 3] : vector<1x2x8x1xf32> to vector<1xf32>
    %514 = vector.shape_cast %513 : vector<1xf32> to vector<1x1x1x1xf32>
    %515 = vector.extract %514[0, 0, 0, 0] : f32 from vector<1x1x1x1xf32>
    %516 = vector.broadcast %515 : f32 to vector<1x1x1xf32>
    %cst_107 = arith.constant 5.000000e-04 : f32
    %517 = vector.broadcast %cst_107 : f32 to vector<1x1x1xf32>
    %518 = arith.mulf %517, %516 : vector<1x1x1xf32>
    %cst_108 = arith.constant 0.000000e+00 : f32
    %519 = vector.broadcast %cst_108 : f32 to vector<1x1x1xf32>
    %520 = arith.cmpf ogt, %485, %519 : vector<1x1x1xf32>
    %521 = vector.shape_cast %520 : vector<1x1x1xi1> to vector<1x1x1xi1>
    %522 = vector.broadcast %521 : vector<1x1x1xi1> to vector<2x8x1xi1>
    %523 = arith.select %522, %477, %497 : vector<2x8x1xi1>, vector<2x8x1xf32>
    %524 = vector.shape_cast %520 : vector<1x1x1xi1> to vector<1x1x1xi1>
    %525 = vector.broadcast %524 : vector<1x1x1xi1> to vector<2x1x8xi1>
    %526 = arith.select %525, %480, %509 : vector<2x1x8xi1>, vector<2x1x8xf32>
    %cst_109 = arith.constant 1.000000e-01 : f32
    %527 = vector.broadcast %cst_109 : f32 to vector<1x1x1xf32>
    %528 = arith.cmpf olt, %518, %527 : vector<1x1x1xf32>
    %529 = arith.extui %528 : vector<1x1x1xi1> to vector<1x1x1xi32>
    %530 = arith.sitofp %529 : vector<1x1x1xi32> to vector<1x1x1xf32>
    %531 = arith.maximumf %485, %530 : vector<1x1x1xf32>
    %532 = vector.broadcast %523 : vector<2x8x1xf32> to vector<2x8x8xf32>
    %533 = arith.addf %60, %532 : vector<2x8x8xf32>
    %534 = vector.broadcast %526 : vector<2x1x8xf32> to vector<2x8x8xf32>
    %535 = arith.addf %533, %534 : vector<2x8x8xf32>
    %536 = math.exp %535 : vector<2x8x8xf32>
    %537 = arith.mulf %536, %60 : vector<2x8x8xf32>
    %cst_110 = arith.constant dense<0.000000e+00> : vector<2x8xf32>
    %538 = vector.multi_reduction <add>, %537, %cst_110 [2] : vector<2x8x8xf32> to vector<2x8xf32>
    %cst_111 = arith.constant dense<0.000000e+00> : vector<2xf32>
    %539 = vector.multi_reduction <add>, %538, %cst_111 [1] : vector<2x8xf32> to vector<2xf32>
    %540 = vector.shape_cast %539 : vector<2xf32> to vector<2x1xf32>
    %cst_112 = arith.constant -1.000000e-03 : f32
    %541 = vector.broadcast %cst_112 : f32 to vector<2x1xf32>
    %542 = arith.mulf %540, %541 : vector<2x1xf32>
    %543 = vector.shape_cast %542 : vector<2x1xf32> to vector<1x2x1xf32>
    %cst_113 = arith.constant dense<0.000000e+00> : vector<1xf32>
    %544 = vector.multi_reduction <add>, %543, %cst_113 [1, 2] : vector<1x2x1xf32> to vector<1xf32>
    %545 = vector.shape_cast %544 : vector<1xf32> to vector<1x1x1xf32>
    %546 = vector.extract %545[0, 0, 0] : f32 from vector<1x1x1xf32>
    %547 = arith.cmpf one, %546, %546 : f32
    %cst_114 = arith.constant 1.000000e+00 : f32
    %548 = vector.broadcast %cst_114 : f32 to vector<2x1xf32>
    %549 = arith.select %547, %548, %542 : vector<2x1xf32>
    %c0_115 = arith.constant 0 : index
    %c0_116 = arith.constant 0 : index
    %550 = vector.load %arg3[%c0_115, %c0_116] : memref<2x1xf32, #tpu.memory_space<vmem>>, vector<2x1xf32>
    tpu.vector_store %arg3[%c0_115, %c0_116], %549 {strides = array<i32>} : memref<2x1xf32, #tpu.memory_space<vmem>>, vector<2x1xf32>,
    return
  }
  func.func @transform_0(%arg0: i32) -> (i32, i32, i32) {
    %c0_i32 = arith.constant 0 : i32
    %c0_i32_0 = arith.constant 0 : i32
    %c0_i32_1 = arith.constant 0 : i32
    %c0_i32_2 = arith.constant 0 : i32
    return %c0_i32, %c0_i32_0, %c0_i32_1 : i32, i32, i32
  }
  func.func @transform_1(%arg0: i32) -> (i32, i32, i32) {
    %c0_i32 = arith.constant 0 : i32
    %c0_i32_0 = arith.constant 0 : i32
    %c0_i32_1 = arith.constant 0 : i32
    %c0_i32_2 = arith.constant 0 : i32
    return %c0_i32, %c0_i32_0, %c0_i32_1 : i32, i32, i32
  }
  func.func @transform_2(%arg0: i32) -> (i32, i32) {
    %c0_i32 = arith.constant 0 : i32
    %c0_i32_0 = arith.constant 0 : i32
    %c0_i32_1 = arith.constant 0 : i32
    return %c0_i32, %c0_i32_0 : i32, i32
  }
}

</mosaic_0001>

<bundles_post_ra>
// kernel: tpu_custom_call.1
= control target key start
LH: loop header
LB: loop body
LE: loop exit
PB: predicated region body
PF: predicated region fallthrough
CT: control target
= control target key end

     0   :  { %7 = vsyncpa [#allocation3], 0  ;;  %s2525_s0 = inlined_call_operand.hbm [shape: f32[2,8,32], index: 0, kind: input, shape index: {}]   ;;  %s2526_s1 = inlined_call_operand.hbm [shape: f32[2,8,32], index: 1, kind: input, shape index: {}]   ;;  %s2527_s2 = inlined_call_operand.vmem [shape: f32[2,1], index: 2, kind: output, shape index: {}]  }
   0x1   :  { %8 = vsyncpa [#allocation5], 0  ;;  %s1911_s9 = smov [#allocation2]  }
   0x2   :  { %s14_s10 = sshll.u32 %s1911_s9, 4  ;;  %s15_s10 = int_to_ptr.vmem [resolvable:$true] %s14_s10 }
   0x3   :  { %s1875_s11 = scalar_lea.vmem %s15_s10, 256  ;;  %p1880_p1 = scmp.lt.s32.totalorder %s15_s10, %s15_s10 }
   0x4   :  { %p1876_p0 = scmp.ne.s32.totalorder %s15_s10, %s1875_s11  ;;  %p1881_p2 = scmp.lt.s32.totalorder %s1875_s11, %s1875_s11 }
   0x6   :  { %p1882_p3 = por %p1881_p2, %p1880_p1 }
   0x8   :  { %p1883_p4 = pnand %p1882_p3, %p1876_p0 }
   0xa   :  { %1886 = shalt.err (!%p1883_p4)
}
   0xb   :  { %s1912_s12 = smov 128   ;;  %s1913_s13 = smov 8  }
   0xc   :  { %20 = dma.hbm_to_vmem [thread:$0]  %s2525_s0, 256, %s15_s10, [#allocation3], %s1912_s12, %s1912_s12, %s1913_s13  }
   0xd   :  { %s1914_s16 = smov [#allocation4]  }
   0xe   :  { %s26_s17 = sshll.u32 %s1914_s16, 4  ;;  %s27_s17 = int_to_ptr.vmem [resolvable:$true] %s26_s17 }
   0xf   :  { %s1895_s18 = scalar_lea.vmem %s27_s17, 256  ;;  %p1900_p6 = scmp.lt.s32.totalorder %s27_s17, %s27_s17 }
  0x10   :  { %p1896_p5 = scmp.ne.s32.totalorder %s27_s17, %s1895_s18  ;;  %p1901_p7 = scmp.lt.s32.totalorder %s1895_s18, %s1895_s18 }
  0x12   :  { %p1902_p8 = por %p1901_p7, %p1900_p6 }
  0x14   :  { %p1903_p9 = pnand %p1902_p8, %p1896_p5 }
  0x16   :  { %1906 = shalt.err (!%p1903_p9)
}
  0x17   :  { %32 = dma.hbm_to_vmem [thread:$0]  %s2526_s1, 256, %s27_s17, [#allocation5], %s1912_s12, %s1912_s12, %s1913_s13  }
  0x18   :  { %1907 = dma.done.wait [#allocation3], 256  }
  0x19   :  { %1908 = vsyncadd [#allocation3], 4294967040 }
  0x1a   :  { %1909 = dma.done.wait [#allocation5], 256  }
  0x1b   :  { %1910 = vsyncadd [#allocation5], 4294967040  ;;  %v41_v0 = vld [vmem:[#allocation4] sm:$0xff]  ;;  %vm45_vm0 = vcmask 261120   ;;  %v39_v1 = vld [vmem:[#allocation2] sm:$0xff]  ;;  %v1915_v12 = vmov 0.0   ;;  %v252_v38 = vlaneseq }
  0x1c   :  { %v42_v2 = vld [vmem:[#allocation4 + $0x8] sm:$0xff]  ;;  %v58_v3 = vmul.f32 %v41_v0, %v41_v0  ;;  %v43_v4 = vmul.f32 %v39_v1, %v39_v1  ;;  %v40_v6 = vld [vmem:[#allocation2 + $0x8] sm:$0xff]  ;;  %1632 = vmatprep.subr.mxu0 %v1915_v12  ;;  %1637 = vmatprep.subr.mxu1 %v1915_v12  ;;  %vm1916_vm1 = vmmov 0   ;;  %vm224_vm2 = vcmask 64512  }
  0x1d   :  { %v59_v5 = vmul.f32 %v42_v2, %v42_v2  ;;  %v44_v7 = vmul.f32 %v40_v6, %v40_v6  ;;  %1634 = vmatprep.mubr.msk.f32.mxu0 %vm1916_vm1, %v1915_v12  ;;  %1639 = vmatprep.mubr.msk.f32.mxu1 %vm1916_vm1, %v1915_v12  ;;  %v253_v40 = vand.u32 127, %v252_v38  ;;  %v1960_v41 = vshrl.u32 %v252_v38, 7 }
  0x1e   :  { %v60_v8 = vsel %vm45_vm0, %v58_v3, 0.0  ;;  %v46_v9 = vsel %vm45_vm0, %v43_v4, 0.0  ;;  %vm262_vm3 = vcmask 1041409   ;;  %vm265_vm4 = vcmask 58368  }
  0x1f   :  { %61 = vadd.xlane.f32.xlu0 %v60_v8  ;;  %47 = vadd.xlane.f32.xlu1 %v46_v9  ;;  %v63_v10 = vsel %vm45_vm0, %v59_v5, 0.0  ;;  %v49_v11 = vsel %vm45_vm0, %v44_v7, 0.0  ;;  %v1963_v44 = vsub.s32 %v253_v40, %v1960_v41  ;;  %v1917_v55 = vmov 0  }
  0x20   :  { %1670 = vset.pattern.permute.xlu0 %v1917_v55  ;;  %1669 = vset.pattern.permute.xlu1 %v1917_v55  ;;  %v1974_v56 = vsub.s32 0, %v1960_v41  ;;  %v277_v57 = vsub.s32 1, %v1960_v41  ;;  %vm465_vm5 = vcmask 7168  }
  0x23   :  { %64 = vadd.xlane.f32.xlu0 %v63_v10  ;;  %50 = vadd.xlane.f32.xlu1 %v49_v11 }
  0xa8   :  { %v62_v13 = vpop.xlane.xlu0 %61  ;;  %v48_v14 = vpop.xlane.xlu1 %47 }
  0xa9   :  { %v66_v15 = vmax.f32 %v62_v13, 1e-24  ;;  %v52_v16 = vmax.f32 %v48_v14, 1e-24 }
  0xab   :  { %1671 = vrsqrt.f32 %v66_v15 }
  0xac   :  { %1673 = vrsqrt.f32 %v52_v16  ;;  %v65_v17 = vpop.xlane.xlu0 %64  ;;  %v51_v18 = vpop.xlane.xlu1 %50 }
  0xad   :  { %v67_v19 = vmax.f32 %v65_v17, 1e-24  ;;  %v53_v20 = vmax.f32 %v51_v18, 1e-24 }
  0xaf   :  { %1675 = vrsqrt.f32 %v67_v19 }
  0xb0   :  { %1677 = vrsqrt.f32 %v53_v20 }
  0xb8   :  { %v1672_v21 = vpop.eup %1671 }
  0xb9   :  { %v1674_v22 = vpop.eup %1673  ;;  %v70_v23 = vmul.f32 %v1672_v21, %v41_v0 }
  0xba   :  { %v56_v24 = vmul.f32 %v1674_v22, %v39_v1 }
  0xbb   :  { %1633 = vmatpush3.xpose.msk.msra.mxu0 %vm45_vm0, %v70_v23 }
  0xbc   :  { %v1676_v25 = vpop.eup %1675 }
  0xbd   :  { %v1678_v26 = vpop.eup %1677  ;;  %v71_v27 = vmul.f32 %v1676_v25, %v42_v2 }
  0xbe   :  { %1635 = vmatmul.mubr.msk.f32.vlgmr.msra.gmra.mxu0 %vm45_vm0, %v56_v24  ;;  %v57_v28 = vmul.f32 %v1678_v26, %v40_v6 }
  0xbf   :  { %1638 = vmatpush3.xpose.msk.msra.mxu1 %vm45_vm0, %v71_v27 }
  0xc2   :  { %1640 = vmatmul.mubr.msk.f32.vlgmr.msra.gmra.mxu1 %vm45_vm0, %v57_v28 }
 0x17e   :  { %v144_v29 = vpop.f32.mrf.mxu0 }
 0x17f   :  { %v1617_v30 = vadd.f32 -1.0, %v144_v29  ;;  %v1952_v31 = vsel %vm224_vm2, %v144_v29, 0.0 }
 0x180   :  { %226 = vadd.xlane.f32.xlu0 %v1952_v31  ;;  %v1636_v32 = vpop.f32.mrf.mxu0  ;;  %v234_v13 = vrot.slane %v1952_v31, 4 }
 0x181   :  { %v1955_v34 = vmul.f32 1000.0, %v1617_v30 }
 0x182   :  { %v220_v33 = vpop.f32.mrf.mxu1  ;;  %v235_v16 = vadd.f32 %v234_v13, %v1952_v31 }
 0x183   :  { %v228_v35 = vsel %vm224_vm2, %v220_v33, 0.0  ;;  %v383_v37 = vsel %vm224_vm2, %v1955_v34, -inf  ;;  %v1618_v48 = vadd.f32 -1.0, %v220_v33 }
 0x184   :  { %229 = vadd.xlane.f32.xlu1 %v228_v35  ;;  %v1641_v36 = vpop.f32.mrf.mxu1  ;;  %v240_v11 = vrot.slane %v228_v35, 4  ;;  %v236_v19 = vrot.slane %v235_v16, 2 }
 0x185   :  { %v1968_v52 = vmul.f32 1000.0, %v1618_v48 }
 0x186   :  { %v241_v14 = vadd.f32 %v240_v11, %v228_v35  ;;  %v237_v22 = vadd.f32 %v236_v19, %v235_v16 }
 0x187   :  { %v386_v54 = vsel %vm224_vm2, %v1968_v52, -inf }
 0x188   :  { %384 = vmax.xlane.f32.xlu1 %v383_v37  ;;  %v242_v18 = vrot.slane %v241_v14, 2  ;;  %v238_v24 = vrot.slane %v237_v22, 1 }
 0x18a   :  { %v243_v21 = vadd.f32 %v242_v18, %v241_v14  ;;  %v239_v26 = vadd.f32 %v238_v24, %v237_v22 }
 0x18c   :  { %v244_v23 = vrot.slane %v243_v21, 1  ;;  %v246_v33 = vmul.f32 0.125, %v239_v26 }
 0x18e   :  { %v245_v25 = vadd.f32 %v244_v23, %v243_v21  ;;  %v326_v38 = vand.u32 2147483647, %v246_v33 }
 0x190   :  { %v247_v31 = vmul.f32 0.125, %v245_v25 }
 0x192   :  { %v327_v37 = vand.u32 2147483647, %v247_v31 }
 0x194   :  { %v330_v40 = vsel %vm262_vm3, %v327_v37, %v326_v38 }
 0x195   :  { %v332_v41 = vsel %vm265_vm4, %v330_v40, 0.0 }
 0x209   :  { %v227_v39 = vpop.xlane.xlu0 %226 }
 0x20a   :  { %v232_v42 = vmul.f32 0.125, %v227_v39 }
 0x20c   :  { %v248_v45 = vand.u32 2147483647, %v232_v42 }
 0x20d   :  { %v230_v43 = vpop.xlane.xlu1 %229 }
 0x20e   :  { %v233_v46 = vmul.f32 0.125, %v230_v43  ;;  %v257_v49 = vrot.slane %v248_v45, %v1963_v44 }
 0x210   :  { %v249_v47 = vand.u32 2147483647, %v233_v46 }
 0x211   :  { %v1984_v6 = vpop.xlane.xlu1 %384 }
 0x212   :  { %v261_v50 = vrot.slane %v249_v47, %v1963_v44  ;;  %v389_v7 = vsub.f32 %v1955_v34, %v1984_v6 }
 0x214   :  { %v263_v51 = vsel %vm262_vm3, %v261_v50, %v257_v49  ;;  %v391_v8 = vmul.f32 1.442695, %v389_v7 }
 0x215   :  { %v266_v53 = vsel %vm265_vm4, %v263_v51, 0.0 }
 0x216   :  { %267 = vadd.xlane.f32.xlu0 %v266_v53 }
 0x21a   :  { %387 = vmax.xlane.f32.xlu0 %v386_v54 }
 0x29f   :  { %v268_v58 = vpop.xlane.xlu0 %267 }
 0x2a0   :  { %v269_v59 = vmax.f32 %v268_v58, 1e-12 }
 0x2a2   :  { %v274_v60 = vrot.slane %v269_v59, %v1974_v56  ;;  %v278_v61 = vrot.slane %v269_v59, %v277_v57 }
 0x2a3   :  { %v1990_v15 = vpop.xlane.xlu0 %387 }
 0x2a4   :  { %1679 = vrcp.f32 %v274_v60  ;;  %v390_v17 = vsub.f32 %v1968_v52, %v1990_v15 }
 0x2a5   :  { %1681 = vrcp.f32 %v278_v61 }
 0x2a6   :  { %1683 = vpow2.f32 %v391_v8  ;;  %v393_v20 = vmul.f32 1.442695, %v390_v17 }
 0x2a8   :  { %1685 = vpow2.f32 %v393_v20 }
 0x2b1   :  { %v1680_v62 = vpop.eup %1679 }
 0x2b2   :  { %v1682_v63 = vpop.eup %1681  ;;  %v1978_v0 = vmul.f32 %v1680_v62, %v232_v42 }
 0x2b3   :  { %v1980_v1 = vmul.f32 %v1682_v63, %v233_v46  ;;  %v1684_v9 = vpop.eup %1683 }
 0x2b4   :  { %v285_v2 = vmax.f32 %v1978_v0, 0.0  ;;  %v395_v10 = vsel %vm224_vm2, %v1684_v9, 0.0 }
 0x2b5   :  { %v286_v3 = vmax.f32 %v1980_v1, 0.0  ;;  %v1686_v36 = vpop.eup %1685 }
 0x2b6   :  { %v287_v4 = vand.u32 2147483647, %v285_v2  ;;  %v398_v39 = vsel %vm224_vm2, %v1686_v36, 0.0 }
 0x2b7   :  { %v288_v5 = vand.u32 2147483647, %v286_v3 }
 0x2b8   :  { %292 = vperm.xlu1 %1669, %v287_v4  }
 0x2b9   :  { %295 = vperm.xlu0 %1670, %v288_v5  }
 0x2d8   :  { %396 = vadd.xlane.f32.xlu0 %v395_v10 }
 0x333   :  { %v293_v27 = vpop.permute.xlu1 %292 }
 0x334   :  { %v296_v28 = vpop.permute.xlu0 %295  ;;  %v300_v29 = vrot.slane %v293_v27, %v1963_v44 }
 0x335   :  { %v304_v30 = vrot.slane %v296_v28, %v1963_v44 }
 0x337   :  { %v305_v32 = vsel %vm262_vm3, %v304_v30, %v300_v29 }
 0x338   :  { %v307_v35 = vsel %vm265_vm4, %v305_v32, 0.0 }
 0x339   :  { %308 = vadd.xlane.f32.xlu1 %v307_v35 }
 0x33d   :  { %399 = vadd.xlane.f32.xlu1 %v398_v39 }
 0x341   :  { %333 = vadd.xlane.f32.xlu1 %v332_v41 }
 0x361   :  { %v397_v51 = vpop.xlane.xlu0 %396 }
 0x3c2   :  { %v309_v42 = vpop.xlane.xlu1 %308 }
 0x3c3   :  { %v310_v43 = vmax.f32 %v309_v42, 1e-12 }
 0x3c5   :  { %v315_v45 = vrot.slane %v310_v43, %v1974_v56  ;;  %v319_v46 = vrot.slane %v310_v43, %v277_v57 }
 0x3c6   :  { %v400_v47 = vpop.xlane.xlu1 %399 }
 0x3c7   :  { %1687 = vrcp.f32 %v315_v45 }
 0x3c8   :  { %1689 = vrcp.f32 %v319_v46 }
 0x3ca   :  { %v334_v48 = vpop.xlane.xlu1 %333 }
 0x3cb   :  { %v335_v49 = vmax.f32 %v334_v48, 1e-12 }
 0x3cd   :  { %v337_v50 = vrot.slane %v335_v49, 1  ;;  %1691 = vrcp.f32 %v335_v49 }
 0x3cf   :  { %1693 = vrcp.f32 %v337_v50 }
 0x3d0   :  { %1695 = vlog2.f32 %v397_v51 }
 0x3d1   :  { %1697 = vlog2.f32 %v400_v47 }
 0x3d4   :  { %v1688_v53 = vpop.eup %1687 }
 0x3d5   :  { %v1690_v54 = vpop.eup %1689  ;;  %v323_v55 = vmul.f32 %v1688_v53, %v285_v2 }
 0x3d6   :  { %v325_v58 = vmul.f32 %v1690_v54, %v286_v3 }
 0x3d7   :  { %v369_v59 = vadd.f32 1e-08, %v323_v55 }
 0x3d8   :  { %v370_v60 = vadd.f32 1e-08, %v325_v58 }
 0x3d9   :  { %1699 = vlog2.f32 %v369_v59 }
 0x3da   :  { %v1692_v61 = vpop.eup %1691  ;;  %1701 = vlog2.f32 %v370_v60 }
 0x3db   :  { %v341_v57 = vmul.f32 %v1692_v61, %v246_v33 }
 0x3dc   :  { %v1694_v62 = vpop.eup %1693 }
 0x3dd   :  { %v2003_v63 = vmul.f32 %v1694_v62, %v247_v31  ;;  %v344_v0 = vmax.f32 %v341_v57, 0.0  ;;  %v1696_v4 = vpop.eup %1695 }
 0x3de   :  { %v402_v7 = vmul.f32 0.6931472, %v1696_v4  ;;  %v1698_v8 = vpop.eup %1697 }
 0x3df   :  { %v345_v1 = vmax.f32 %v2003_v63, 0.0  ;;  %v346_v2 = vand.u32 2147483647, %v344_v0  ;;  %v404_v17 = vmul.f32 0.6931472, %v1698_v8 }
 0x3e0   :  { %v405_v14 = vadd.f32 %v402_v7, %v1984_v6 }
 0x3e1   :  { %v347_v5 = vand.u32 2147483647, %v345_v1  ;;  %v406_v20 = vadd.f32 %v404_v17, %v1990_v15 }
 0x3e3   :  { %v350_v3 = vrot.slane %v347_v5, 7 }
 0x3e5   :  { %v351_v9 = vsel %vm262_vm3, %v350_v3, %v346_v2 }
 0x3e6   :  { %v1700_v10 = vpop.eup %1699  ;;  %v353_v11 = vsel %vm265_vm4, %v351_v9, 0.0 }
 0x3e7   :  { %v1702_v13 = vpop.eup %1701  ;;  %v2011_v16 = vmul.f32 0.6931472, %v1700_v10  ;;  %354 = vadd.xlane.f32.xlu0 %v353_v11 }
 0x3e8   :  { %v2013_v18 = vmul.f32 0.6931472, %v1702_v13 }
 0x3e9   :  { %v2016_v19 = vsub.f32 %v2011_v16, %v405_v14 }
 0x3ea   :  { %v2021_v21 = vsub.f32 %v2013_v18, %v406_v20 }
 0x3eb   :  { %411 = vperm.xlu1 %1669, %v2016_v19  }
 0x3ef   :  { %416 = vperm.xlu1 %1669, %v2021_v21  }
 0x466   :  { %v412_v22 = vpop.permute.xlu1 %411 }
 0x467   :  { %v419_v6 = vadd.f32 %v412_v22, %v1955_v34 }
 0x469   :  { %v421_v23 = vsel %vm224_vm2, %v419_v6, -inf }
 0x46a   :  { %v422_v24 = vrot.slane %v421_v23, 4  ;;  %v417_v25 = vpop.permute.xlu1 %416 }
 0x46b   :  { %v420_v26 = vadd.f32 %v417_v25, %v1968_v52 }
 0x46c   :  { %v423_v27 = vmax.f32 %v421_v23, %v422_v24 }
 0x46d   :  { %v428_v28 = vsel %vm224_vm2, %v420_v26, -inf }
 0x46e   :  { %v424_v15 = vrot.slane %v423_v27, 2  ;;  %v429_v29 = vrot.slane %v428_v28, 4 }
 0x470   :  { %v425_v30 = vmax.f32 %v423_v27, %v424_v15  ;;  %v430_v31 = vmax.f32 %v428_v28, %v429_v29  ;;  %v355_v37 = vpop.xlane.xlu0 %354 }
 0x471   :  { %v356_v42 = vmax.f32 %v355_v37, 1e-12 }
 0x472   :  { %v426_v32 = vrot.slane %v425_v30, 1  ;;  %v431_v33 = vrot.slane %v430_v31, 2 }
 0x473   :  { %v358_v46 = vrot.slane %v356_v42, 1 }
 0x474   :  { %v427_v35 = vmax.f32 %v425_v30, %v426_v32  ;;  %v432_v36 = vmax.f32 %v430_v31, %v431_v33 }
 0x476   :  { %v435_v38 = vsub.f32 %v419_v6, %v427_v35  ;;  %v433_v39 = vrot.slane %v432_v36, 1 }
 0x478   :  { %v437_v40 = vmul.f32 1.442695, %v435_v38  ;;  %v434_v41 = vmax.f32 %v432_v36, %v433_v39  ;;  %v463_v39 = vand.u32 2147483647, %v2016_v19 }
 0x47a   :  { %1703 = vpow2.f32 %v437_v40  ;;  %v436_v43 = vsub.f32 %v420_v26, %v434_v41  ;;  %v464_v40 = vand.u32 2147483647, %v2021_v21 }
 0x47b   :  { %1705 = vrcp.f32 %v356_v42 }
 0x47c   :  { %v439_v45 = vmul.f32 1.442695, %v436_v43  ;;  %v466_v43 = vsel %vm465_vm5, %v463_v39, 0.0 }
 0x47e   :  { %1707 = vpow2.f32 %v439_v45  ;;  %v467_v45 = vsel %vm465_vm5, %v464_v40, 0.0 }
 0x47f   :  { %1709 = vrcp.f32 %v358_v46  ;;  %v468_v46 = vadd.f32 %v467_v45, %v466_v43 }
 0x487   :  { %v1704_v47 = vpop.eup %1703 }
 0x488   :  { %v441_v48 = vsel %vm224_vm2, %v1704_v47, 0.0  ;;  %v1706_v49 = vpop.eup %1705 }
 0x489   :  { %v442_v50 = vrot.slane %v441_v48, 4  ;;  %v362_v55 = vmul.f32 %v1706_v49, %v344_v0 }
 0x48b   :  { %v1708_v51 = vpop.eup %1707  ;;  %v443_v53 = vadd.f32 %v442_v50, %v441_v48  ;;  %v375_v4 = vadd.f32 1e-08, %v362_v55 }
 0x48c   :  { %v448_v54 = vsel %vm224_vm2, %v1708_v51, 0.0  ;;  %v1710_v58 = vpop.eup %1709 }
 0x48d   :  { %v444_v59 = vrot.slane %v443_v53, 2  ;;  %v449_v60 = vrot.slane %v448_v54, 4  ;;  %v364_v62 = vmul.f32 %v1710_v58, %v345_v1  ;;  %1711 = vlog2.f32 %v375_v4 }
 0x48f   :  { %v445_v61 = vadd.f32 %v444_v59, %v443_v53  ;;  %v450_v57 = vadd.f32 %v449_v60, %v448_v54  ;;  %v376_v8 = vadd.f32 1e-08, %v364_v62 }
 0x491   :  { %v446_v5 = vrot.slane %v445_v61, 1  ;;  %v451_v7 = vrot.slane %v450_v57, 2 }
 0x493   :  { %v447_v2 = vadd.f32 %v446_v5, %v445_v61  ;;  %v452_v3 = vadd.f32 %v451_v7, %v450_v57 }
 0x495   :  { %1713 = vlog2.f32 %v447_v2  ;;  %v453_v9 = vrot.slane %v452_v3, 1 }
 0x496   :  { %1715 = vlog2.f32 %v376_v8 }
 0x497   :  { %v454_v10 = vadd.f32 %v453_v9, %v452_v3 }
 0x499   :  { %1717 = vlog2.f32 %v454_v10 }
 0x49a   :  { %v1712_v0 = vpop.eup %1711 }
 0x49b   :  { %v2032_v20 = vmul.f32 0.6931472, %v1712_v0 }
 0x4a2   :  { %v1714_v11 = vpop.eup %1713 }
 0x4a3   :  { %v456_v13 = vmul.f32 0.6931472, %v1714_v11  ;;  %v1716_v14 = vpop.eup %1715 }
 0x4a4   :  { %v2037_v23 = vmul.f32 0.6931472, %v1716_v14 }
 0x4a5   :  { %v459_v17 = vadd.f32 %v456_v13, %v427_v35 }
 0x4a6   :  { %v1718_v63 = vpop.eup %1717 }
 0x4a7   :  { %v458_v1 = vmul.f32 0.6931472, %v1718_v63  ;;  %v2035_v22 = vsub.f32 %v2032_v20, %v459_v17 }
 0x4a9   :  { %v460_v6 = vadd.f32 %v458_v1, %v434_v41  ;;  %v494_v24 = vrot.slane %v2035_v22, %v1974_v56 }
 0x4ab   :  { %v499_v25 = vadd.f32 %v494_v24, %v1955_v34  ;;  %v2043_v26 = vsub.f32 %v2037_v23, %v460_v6 }
 0x4ad   :  { %v501_v27 = vsel %vm224_vm2, %v499_v25, -inf  ;;  %v498_v28 = vrot.slane %v2043_v26, %v1974_v56 }
 0x4ae   :  { %502 = vmax.xlane.f32.xlu1 %v501_v27 }
 0x4af   :  { %v500_v15 = vadd.f32 %v498_v28, %v1968_v52 }
 0x4b1   :  { %v504_v29 = vsel %vm224_vm2, %v500_v15, -inf }
 0x4b2   :  { %505 = vmax.xlane.f32.xlu0 %v504_v29 }
 0x537   :  { %v503_v30 = vpop.xlane.xlu1 %502 }
 0x538   :  { %v507_v31 = vsub.f32 %v499_v25, %v503_v30 }
 0x53a   :  { %v509_v32 = vmul.f32 1.442695, %v507_v31 }
 0x53b   :  { %v506_v33 = vpop.xlane.xlu0 %505 }
 0x53c   :  { %1719 = vpow2.f32 %v509_v32  ;;  %v508_v35 = vsub.f32 %v500_v15, %v506_v33 }
 0x53e   :  { %v511_v36 = vmul.f32 1.442695, %v508_v35 }
 0x540   :  { %1721 = vpow2.f32 %v511_v36 }
 0x549   :  { %v1720_v37 = vpop.eup %1719 }
 0x54a   :  { %v513_v38 = vsel %vm224_vm2, %v1720_v37, 0.0 }
 0x54b   :  { %514 = vadd.xlane.f32.xlu0 %v513_v38 }
 0x54d   :  { %v1722_v41 = vpop.eup %1721 }
 0x54e   :  { %v516_v42 = vsel %vm224_vm2, %v1722_v41, 0.0 }
 0x54f   :  { %517 = vadd.xlane.f32.xlu0 %v516_v42 }
 0x553   :  { %469 = vadd.xlane.f32.xlu0 %v468_v46 }
 0x5d4   :  { %v515_v47 = vpop.xlane.xlu0 %514 }
 0x5d5   :  { %1723 = vlog2.f32 %v515_v47 }
 0x5d8   :  { %v518_v48 = vpop.xlane.xlu0 %517 }
 0x5d9   :  { %1725 = vlog2.f32 %v518_v48 }
 0x5dc   :  { %v470_v49 = vpop.xlane.xlu0 %469 }
 0x5dd   :  { %v471_v50 = vrot.slane %v470_v49, 4 }
 0x5df   :  { %v472_v51 = vadd.f32 %v471_v50, %v470_v49 }
 0x5e1   :  { %v473_v53 = vrot.slane %v472_v51, 2 }
 0x5e2   :  { %v1724_v54 = vpop.eup %1723 }
 0x5e3   :  { %v520_v55 = vmul.f32 0.6931472, %v1724_v54  ;;  %v474_v58 = vadd.f32 %v473_v53, %v472_v51 }
 0x5e5   :  { %v523_v59 = vadd.f32 %v520_v55, %v503_v30  ;;  %v475_v60 = vrot.slane %v474_v58, 1 }
 0x5e6   :  { %v1726_v61 = vpop.eup %1725 }
 0x5e7   :  { %v522_v57 = vmul.f32 0.6931472, %v1726_v61  ;;  %v2057_v62 = vsub.f32 %v2011_v16, %v523_v59  ;;  %v476_v4 = vadd.f32 %v475_v60, %v474_v58 }
 0x5e9   :  { %529 = vperm.xlu0 %1670, %v2057_v62   ;;  %1642 = vpush %v476_v4  ;;  %v524_v5 = vadd.f32 %v522_v57, %v506_v33  ;;  %v581_v7 = vsub.f32 %v2057_v62, %v2016_v19 }
 0x5eb   :  { %v2063_v2 = vsub.f32 %v2013_v18, %v524_v5  ;;  %v583_v8 = vand.u32 2147483647, %v581_v7 }
 0x5ed   :  { %534 = vperm.xlu1 %1669, %v2063_v2   ;;  %v582_v3 = vsub.f32 %v2063_v2, %v2021_v21  ;;  %v585_v10 = vsel %vm465_vm5, %v583_v8, 0.0 }
 0x5ef   :  { %v584_v9 = vand.u32 2147483647, %v582_v3 }
 0x5f1   :  { %v586_v0 = vsel %vm465_vm5, %v584_v9, 0.0 }
 0x5f2   :  { %v2070_v11 = vadd.f32 %v586_v0, %v585_v10 }
 0x61a   :  { %s1643_s0 = spop %1642 }
 0x61b   :  { %v478_v60 = vstv %s1643_s0 }
 0x61c   :  { %v479_v57 = vmul.f32 0.0005, %v478_v60 }
 0x61e   :  { %vm487_vm6 = vcmp.lt.f32.partialorder %v479_v57, 0.1 }
 0x61f   :  { %v2079_v4 = vsel %vm487_vm6, 1.0, %v1915_v12 }
 0x620   :  { %v490_v3 = vmax.f32 %v2079_v4, 0.0 }
 0x622   :  { %vm2085_vm7 = vcmp.gt.f32.partialorder %v490_v3, 0.0 }
 0x623   :  { %v603_v60 = vsel %vm2085_vm7, %v2021_v21, %v2063_v2 }
 0x664   :  { %v530_v13 = vpop.permute.xlu0 %529 }
 0x665   :  { %v537_v14 = vadd.f32 %v530_v13, %v1955_v34 }
 0x667   :  { %v539_v17 = vsel %vm224_vm2, %v537_v14, -inf }
 0x668   :  { %v540_v63 = vrot.slane %v539_v17, 4  ;;  %v535_v1 = vpop.permute.xlu1 %534 }
 0x669   :  { %v538_v6 = vadd.f32 %v535_v1, %v1968_v52 }
 0x66a   :  { %v541_v24 = vmax.f32 %v539_v17, %v540_v63 }
 0x66b   :  { %v546_v25 = vsel %vm224_vm2, %v538_v6, -inf }
 0x66c   :  { %v542_v27 = vrot.slane %v541_v24, 2  ;;  %v547_v28 = vrot.slane %v546_v25, 4 }
 0x66e   :  { %v543_v15 = vmax.f32 %v541_v24, %v542_v27  ;;  %v548_v29 = vmax.f32 %v546_v25, %v547_v28 }
 0x670   :  { %v544_v30 = vrot.slane %v543_v15, 1  ;;  %v549_v31 = vrot.slane %v548_v29, 2 }
 0x672   :  { %v545_v32 = vmax.f32 %v543_v15, %v544_v30  ;;  %v550_v33 = vmax.f32 %v548_v29, %v549_v31 }
 0x674   :  { %v553_v35 = vsub.f32 %v537_v14, %v545_v32  ;;  %v551_v36 = vrot.slane %v550_v33, 1 }
 0x676   :  { %v555_v37 = vmul.f32 1.442695, %v553_v35  ;;  %v552_v38 = vmax.f32 %v550_v33, %v551_v36 }
 0x678   :  { %1727 = vpow2.f32 %v555_v37  ;;  %v554_v39 = vsub.f32 %v538_v6, %v552_v38 }
 0x67a   :  { %v557_v40 = vmul.f32 1.442695, %v554_v39 }
 0x67c   :  { %1729 = vpow2.f32 %v557_v40 }
 0x685   :  { %v1728_v41 = vpop.eup %1727 }
 0x686   :  { %v559_v42 = vsel %vm224_vm2, %v1728_v41, 0.0 }
 0x687   :  { %v560_v43 = vrot.slane %v559_v42, 4 }
 0x689   :  { %v1730_v45 = vpop.eup %1729  ;;  %v561_v46 = vadd.f32 %v560_v43, %v559_v42 }
 0x68a   :  { %v566_v47 = vsel %vm224_vm2, %v1730_v45, 0.0 }
 0x68b   :  { %v562_v48 = vrot.slane %v561_v46, 2  ;;  %v567_v49 = vrot.slane %v566_v47, 4 }
 0x68d   :  { %v563_v50 = vadd.f32 %v562_v48, %v561_v46  ;;  %v568_v51 = vadd.f32 %v567_v49, %v566_v47 }
 0x68f   :  { %v564_v53 = vrot.slane %v563_v50, 1  ;;  %v569_v54 = vrot.slane %v568_v51, 2 }
 0x691   :  { %v565_v55 = vadd.f32 %v564_v53, %v563_v50  ;;  %v570_v58 = vadd.f32 %v569_v54, %v568_v51 }
 0x693   :  { %1731 = vlog2.f32 %v565_v55  ;;  %v571_v59 = vrot.slane %v570_v58, 1 }
 0x695   :  { %v572_v61 = vadd.f32 %v571_v59, %v570_v58 }
 0x697   :  { %1733 = vlog2.f32 %v572_v61 }
 0x6a0   :  { %v1732_v5 = vpop.eup %1731 }
 0x6a1   :  { %v574_v7 = vmul.f32 0.6931472, %v1732_v5 }
 0x6a3   :  { %v577_v8 = vadd.f32 %v574_v7, %v545_v32 }
 0x6a4   :  { %v1734_v9 = vpop.eup %1733 }
 0x6a5   :  { %v579_v10 = vsub.f32 %v2032_v20, %v577_v8  ;;  %v576_v0 = vmul.f32 0.6931472, %v1734_v9 }
 0x6a7   :  { %v578_v14 = vadd.f32 %v576_v0, %v552_v38  ;;  %v2092_v17 = vsel %vm2085_vm7, %v2035_v22, %v579_v10 }
 0x6a8   :  { %v613_v63 = vrot.slane %v2092_v17, %v1974_v56 }
 0x6a9   :  { %v580_v1 = vsub.f32 %v2037_v23, %v578_v14 }
 0x6aa   :  { %v618_v6 = vadd.f32 %v613_v63, %v1955_v34 }
 0x6ab   :  { %v2101_v24 = vsel %vm2085_vm7, %v2043_v26, %v580_v1 }
 0x6ac   :  { %v620_v25 = vsel %vm224_vm2, %v618_v6, -inf  ;;  %v617_v27 = vrot.slane %v2101_v24, %v1974_v56 }
 0x6ad   :  { %621 = vmax.xlane.f32.xlu0 %v620_v25 }
 0x6ae   :  { %v619_v22 = vadd.f32 %v617_v27, %v1968_v52 }
 0x6b0   :  { %v623_v28 = vsel %vm224_vm2, %v619_v22, -inf }
 0x6b1   :  { %624 = vmax.xlane.f32.xlu1 %v623_v28 }
 0x736   :  { %v622_v15 = vpop.xlane.xlu0 %621 }
 0x737   :  { %v626_v29 = vsub.f32 %v618_v6, %v622_v15 }
 0x739   :  { %v628_v30 = vmul.f32 1.442695, %v626_v29 }
 0x73a   :  { %v625_v31 = vpop.xlane.xlu1 %624 }
 0x73b   :  { %1735 = vpow2.f32 %v628_v30  ;;  %v627_v32 = vsub.f32 %v619_v22, %v625_v31 }
 0x73d   :  { %v630_v33 = vmul.f32 1.442695, %v627_v32 }
 0x73f   :  { %1737 = vpow2.f32 %v630_v33 }
 0x748   :  { %v1736_v26 = vpop.eup %1735 }
 0x749   :  { %v632_v35 = vsel %vm224_vm2, %v1736_v26, 0.0 }
 0x74a   :  { %633 = vadd.xlane.f32.xlu0 %v632_v35 }
 0x74c   :  { %v1738_v36 = vpop.eup %1737 }
 0x74d   :  { %v635_v37 = vsel %vm224_vm2, %v1738_v36, 0.0 }
 0x74e   :  { %636 = vadd.xlane.f32.xlu0 %v635_v37 }
 0x752   :  { %588 = vadd.xlane.f32.xlu0 %v2070_v11  ;;  %v602_v11 = vsel %vm2085_vm7, %v2016_v19, %v2057_v62 }
 0x7d3   :  { %v634_v38 = vpop.xlane.xlu0 %633 }
 0x7d4   :  { %1739 = vlog2.f32 %v634_v38 }
 0x7d7   :  { %v637_v39 = vpop.xlane.xlu0 %636 }
 0x7d8   :  { %1741 = vlog2.f32 %v637_v39 }
 0x7db   :  { %v589_v40 = vpop.xlane.xlu0 %588 }
 0x7dc   :  { %v590_v41 = vrot.slane %v589_v40, 4 }
 0x7de   :  { %v591_v42 = vadd.f32 %v590_v41, %v589_v40 }
 0x7e0   :  { %v592_v43 = vrot.slane %v591_v42, 2 }
 0x7e1   :  { %v1740_v45 = vpop.eup %1739 }
 0x7e2   :  { %v639_v46 = vmul.f32 0.6931472, %v1740_v45  ;;  %v593_v47 = vadd.f32 %v592_v43, %v591_v42 }
 0x7e4   :  { %v642_v48 = vadd.f32 %v639_v46, %v622_v15  ;;  %v594_v49 = vrot.slane %v593_v47, 1 }
 0x7e5   :  { %v1742_v50 = vpop.eup %1741 }
 0x7e6   :  { %v641_v51 = vmul.f32 0.6931472, %v1742_v50  ;;  %v644_v53 = vsub.f32 %v2011_v16, %v642_v48  ;;  %v595_v54 = vadd.f32 %v594_v49, %v593_v47 }
 0x7e8   :  { %648 = vperm.xlu0 %1670, %v644_v53   ;;  %1644 = vpush %v595_v54  ;;  %v643_v55 = vadd.f32 %v641_v51, %v625_v31  ;;  %v700_v58 = vsub.f32 %v644_v53, %v602_v11 }
 0x7ea   :  { %v645_v59 = vsub.f32 %v2013_v18, %v643_v55  ;;  %v702_v57 = vand.u32 2147483647, %v700_v58 }
 0x7ec   :  { %653 = vperm.xlu1 %1669, %v645_v59   ;;  %v701_v61 = vsub.f32 %v645_v59, %v603_v60  ;;  %v704_v7 = vsel %vm465_vm5, %v702_v57, 0.0 }
 0x7ee   :  { %v703_v5 = vand.u32 2147483647, %v701_v61 }
 0x7f0   :  { %v705_v8 = vsel %vm465_vm5, %v703_v5, 0.0 }
 0x7f1   :  { %v2123_v19 = vadd.f32 %v705_v8, %v704_v7 }
 0x819   :  { %s1645_s1 = spop %1644 }
 0x81a   :  { %v597_v62 = vstv %s1645_s1 }
 0x81b   :  { %v598_v9 = vmul.f32 0.0005, %v597_v62 }
 0x81d   :  { %vm606_vm8 = vcmp.lt.f32.partialorder %v598_v9, 0.1 }
 0x81e   :  { %v1620_v10 = vsel %vm606_vm8, 1.0, %v1915_v12 }
 0x81f   :  { %v2128_v0 = vmax.f32 %v490_v3, %v1620_v10 }
 0x821   :  { %vm718_vm9 = vcmp.gt.f32.partialorder %v2128_v0, 0.0 }
 0x822   :  { %v2133_v21 = vsel %vm718_vm9, %v602_v11, %v644_v53  ;;  %v2137_v2 = vsel %vm718_vm9, %v603_v60, %v645_v59 }
 0x863   :  { %v649_v13 = vpop.permute.xlu0 %648 }
 0x864   :  { %v656_v14 = vadd.f32 %v649_v13, %v1955_v34 }
 0x866   :  { %v658_v63 = vsel %vm224_vm2, %v656_v14, -inf }
 0x867   :  { %v659_v1 = vrot.slane %v658_v63, 4  ;;  %v654_v6 = vpop.permute.xlu1 %653 }
 0x868   :  { %v657_v4 = vadd.f32 %v654_v6, %v1968_v52 }
 0x869   :  { %v660_v3 = vmax.f32 %v658_v63, %v659_v1 }
 0x86a   :  { %v665_v25 = vsel %vm224_vm2, %v657_v4, -inf }
 0x86b   :  { %v661_v27 = vrot.slane %v660_v3, 2  ;;  %v666_v22 = vrot.slane %v665_v25, 4 }
 0x86d   :  { %v662_v28 = vmax.f32 %v660_v3, %v661_v27  ;;  %v667_v15 = vmax.f32 %v665_v25, %v666_v22 }
 0x86f   :  { %v663_v29 = vrot.slane %v662_v28, 1  ;;  %v668_v30 = vrot.slane %v667_v15, 2 }
 0x871   :  { %v664_v31 = vmax.f32 %v662_v28, %v663_v29  ;;  %v669_v32 = vmax.f32 %v667_v15, %v668_v30 }
 0x873   :  { %v672_v33 = vsub.f32 %v656_v14, %v664_v31  ;;  %v670_v26 = vrot.slane %v669_v32, 1 }
 0x875   :  { %v674_v35 = vmul.f32 1.442695, %v672_v33  ;;  %v671_v36 = vmax.f32 %v669_v32, %v670_v26 }
 0x877   :  { %1743 = vpow2.f32 %v674_v35  ;;  %v673_v37 = vsub.f32 %v657_v4, %v671_v36 }
 0x879   :  { %v676_v38 = vmul.f32 1.442695, %v673_v37 }
 0x87b   :  { %1745 = vpow2.f32 %v676_v38 }
 0x884   :  { %v1744_v39 = vpop.eup %1743 }
 0x885   :  { %v678_v40 = vsel %vm224_vm2, %v1744_v39, 0.0 }
 0x886   :  { %v679_v41 = vrot.slane %v678_v40, 4 }
 0x888   :  { %v1746_v42 = vpop.eup %1745  ;;  %v680_v43 = vadd.f32 %v679_v41, %v678_v40 }
 0x889   :  { %v685_v45 = vsel %vm224_vm2, %v1746_v42, 0.0 }
 0x88a   :  { %v681_v46 = vrot.slane %v680_v43, 2  ;;  %v686_v47 = vrot.slane %v685_v45, 4 }
 0x88c   :  { %v682_v48 = vadd.f32 %v681_v46, %v680_v43  ;;  %v687_v49 = vadd.f32 %v686_v47, %v685_v45 }
 0x88e   :  { %v683_v50 = vrot.slane %v682_v48, 1  ;;  %v688_v51 = vrot.slane %v687_v49, 2 }
 0x890   :  { %v684_v53 = vadd.f32 %v683_v50, %v682_v48  ;;  %v689_v54 = vadd.f32 %v688_v51, %v687_v49 }
 0x892   :  { %1747 = vlog2.f32 %v684_v53  ;;  %v690_v11 = vrot.slane %v689_v54, 1 }
 0x894   :  { %v691_v55 = vadd.f32 %v690_v11, %v689_v54 }
 0x896   :  { %1749 = vlog2.f32 %v691_v55 }
 0x89f   :  { %v1748_v58 = vpop.eup %1747 }
 0x8a0   :  { %v693_v59 = vmul.f32 0.6931472, %v1748_v58 }
 0x8a2   :  { %v696_v60 = vadd.f32 %v693_v59, %v664_v31 }
 0x8a3   :  { %v1750_v61 = vpop.eup %1749 }
 0x8a4   :  { %v698_v57 = vsub.f32 %v2032_v20, %v696_v60  ;;  %v695_v5 = vmul.f32 0.6931472, %v1750_v61 }
 0x8a6   :  { %v697_v7 = vadd.f32 %v695_v5, %v671_v36  ;;  %v2149_v8 = vsel %vm718_vm9, %v2092_v17, %v698_v57 }
 0x8a7   :  { %v732_v62 = vrot.slane %v2149_v8, %v1974_v56 }
 0x8a8   :  { %v699_v9 = vsub.f32 %v2037_v23, %v697_v7 }
 0x8a9   :  { %v737_v10 = vadd.f32 %v732_v62, %v1955_v34 }
 0x8aa   :  { %v2158_v13 = vsel %vm718_vm9, %v2101_v24, %v699_v9 }
 0x8ab   :  { %v739_v14 = vsel %vm224_vm2, %v737_v10, -inf  ;;  %v736_v63 = vrot.slane %v2158_v13, %v1974_v56 }
 0x8ac   :  { %740 = vmax.xlane.f32.xlu0 %v739_v14 }
 0x8ad   :  { %v738_v17 = vadd.f32 %v736_v63, %v1968_v52 }
 0x8af   :  { %v742_v1 = vsel %vm224_vm2, %v738_v17, -inf }
 0x8b0   :  { %743 = vmax.xlane.f32.xlu1 %v742_v1 }
 0x8b4   :  { %707 = vadd.xlane.f32.xlu1 %v2123_v19 }
 0x935   :  { %v741_v6 = vpop.xlane.xlu0 %740 }
 0x936   :  { %v745_v4 = vsub.f32 %v737_v10, %v741_v6 }
 0x938   :  { %v747_v3 = vmul.f32 1.442695, %v745_v4 }
 0x939   :  { %v744_v25 = vpop.xlane.xlu1 %743 }
 0x93a   :  { %1751 = vpow2.f32 %v747_v3  ;;  %v746_v24 = vsub.f32 %v738_v17, %v744_v25 }
 0x93c   :  { %v749_v27 = vmul.f32 1.442695, %v746_v24 }
 0x93d   :  { %v708_v22 = vpop.xlane.xlu1 %707 }
 0x93e   :  { %1753 = vpow2.f32 %v749_v27  ;;  %v709_v28 = vrot.slane %v708_v22, 4 }
 0x940   :  { %v710_v15 = vadd.f32 %v709_v28, %v708_v22 }
 0x942   :  { %v711_v29 = vrot.slane %v710_v15, 2 }
 0x944   :  { %v712_v30 = vadd.f32 %v711_v29, %v710_v15 }
 0x946   :  { %v713_v31 = vrot.slane %v712_v30, 1 }
 0x947   :  { %v1752_v32 = vpop.eup %1751 }
 0x948   :  { %v751_v33 = vsel %vm224_vm2, %v1752_v32, 0.0  ;;  %v714_v26 = vadd.f32 %v713_v31, %v712_v30 }
 0x949   :  { %752 = vadd.xlane.f32.xlu0 %v751_v33 }
 0x94a   :  { %1646 = vpush %v714_v26 }
 0x94b   :  { %v1754_v19 = vpop.eup %1753 }
 0x94c   :  { %v754_v35 = vsel %vm224_vm2, %v1754_v19, 0.0 }
 0x94d   :  { %755 = vadd.xlane.f32.xlu0 %v754_v35 }
 0x97b   :  { %s1647_s21 = spop %1646 }
 0x97c   :  { %v716_v37 = vstv %s1647_s21 }
 0x97d   :  { %v717_v39 = vmul.f32 0.0005, %v716_v37 }
 0x97f   :  { %vm725_vm10 = vcmp.lt.f32.partialorder %v717_v39, 0.1 }
 0x980   :  { %v1621_v40 = vsel %vm725_vm10, 1.0, %v1915_v12 }
 0x981   :  { %v2170_v43 = vmax.f32 %v2128_v0, %v1621_v40 }
 0x983   :  { %vm837_vm11 = vcmp.gt.f32.partialorder %v2170_v43, 0.0 }
 0x9d2   :  { %v753_v36 = vpop.xlane.xlu0 %752 }
 0x9d3   :  { %1755 = vlog2.f32 %v753_v36 }
 0x9d6   :  { %v756_v38 = vpop.xlane.xlu0 %755 }
 0x9d7   :  { %1757 = vlog2.f32 %v756_v38 }
 0x9e0   :  { %v1756_v41 = vpop.eup %1755 }
 0x9e1   :  { %v758_v42 = vmul.f32 0.6931472, %v1756_v41 }
 0x9e3   :  { %v761_v45 = vadd.f32 %v758_v42, %v741_v6 }
 0x9e4   :  { %v1758_v46 = vpop.eup %1757 }
 0x9e5   :  { %v760_v47 = vmul.f32 0.6931472, %v1758_v46  ;;  %v763_v48 = vsub.f32 %v2011_v16, %v761_v45 }
 0x9e7   :  { %767 = vperm.xlu0 %1670, %v763_v48   ;;  %v762_v49 = vadd.f32 %v760_v47, %v744_v25  ;;  %v819_v50 = vsub.f32 %v763_v48, %v2133_v21  ;;  %v2178_v51 = vsel %vm837_vm11, %v2133_v21, %v763_v48 }
 0x9e9   :  { %v764_v53 = vsub.f32 %v2013_v18, %v762_v49  ;;  %v821_v54 = vand.u32 2147483647, %v819_v50 }
 0x9eb   :  { %772 = vperm.xlu1 %1669, %v764_v53   ;;  %v820_v0 = vsub.f32 %v764_v53, %v2137_v2  ;;  %v2185_v11 = vsel %vm837_vm11, %v2137_v2, %v764_v53  ;;  %v823_v58 = vsel %vm465_vm5, %v821_v54, 0.0 }
 0x9ed   :  { %v822_v55 = vand.u32 2147483647, %v820_v0 }
 0x9ef   :  { %v824_v59 = vsel %vm465_vm5, %v822_v55, 0.0 }
 0x9f0   :  { %v2189_v60 = vadd.f32 %v824_v59, %v823_v58 }
 0xa62   :  { %v768_v21 = vpop.permute.xlu0 %767 }
 0xa63   :  { %v775_v61 = vadd.f32 %v768_v21, %v1955_v34 }
 0xa65   :  { %v777_v57 = vsel %vm224_vm2, %v775_v61, -inf }
 0xa66   :  { %v778_v5 = vrot.slane %v777_v57, 4  ;;  %v773_v7 = vpop.permute.xlu1 %772 }
 0xa67   :  { %v776_v62 = vadd.f32 %v773_v7, %v1968_v52 }
 0xa68   :  { %v779_v9 = vmax.f32 %v777_v57, %v778_v5 }
 0xa69   :  { %v784_v2 = vsel %vm224_vm2, %v776_v62, -inf }
 0xa6a   :  { %v780_v10 = vrot.slane %v779_v9, 2  ;;  %v785_v14 = vrot.slane %v784_v2, 4 }
 0xa6c   :  { %v781_v63 = vmax.f32 %v779_v9, %v780_v10  ;;  %v786_v17 = vmax.f32 %v784_v2, %v785_v14 }
 0xa6e   :  { %v782_v1 = vrot.slane %v781_v63, 1  ;;  %v787_v6 = vrot.slane %v786_v17, 2 }
 0xa70   :  { %v783_v4 = vmax.f32 %v781_v63, %v782_v1  ;;  %v788_v3 = vmax.f32 %v786_v17, %v787_v6 }
 0xa72   :  { %v791_v25 = vsub.f32 %v775_v61, %v783_v4  ;;  %v789_v24 = vrot.slane %v788_v3, 1 }
 0xa74   :  { %v793_v27 = vmul.f32 1.442695, %v791_v25  ;;  %v790_v22 = vmax.f32 %v788_v3, %v789_v24 }
 0xa76   :  { %1759 = vpow2.f32 %v793_v27  ;;  %v792_v28 = vsub.f32 %v776_v62, %v790_v22 }
 0xa78   :  { %v795_v15 = vmul.f32 1.442695, %v792_v28 }
 0xa7a   :  { %1761 = vpow2.f32 %v795_v15 }
 0xa83   :  { %v1760_v29 = vpop.eup %1759 }
 0xa84   :  { %v797_v30 = vsel %vm224_vm2, %v1760_v29, 0.0 }
 0xa85   :  { %v798_v31 = vrot.slane %v797_v30, 4 }
 0xa87   :  { %v1762_v32 = vpop.eup %1761  ;;  %v799_v33 = vadd.f32 %v798_v31, %v797_v30 }
 0xa88   :  { %v804_v26 = vsel %vm224_vm2, %v1762_v32, 0.0 }
 0xa89   :  { %v800_v19 = vrot.slane %v799_v33, 2  ;;  %v805_v35 = vrot.slane %v804_v26, 4 }
 0xa8b   :  { %v801_v36 = vadd.f32 %v800_v19, %v799_v33  ;;  %v806_v37 = vadd.f32 %v805_v35, %v804_v26 }
 0xa8d   :  { %v802_v38 = vrot.slane %v801_v36, 1  ;;  %v807_v39 = vrot.slane %v806_v37, 2 }
 0xa8f   :  { %v803_v40 = vadd.f32 %v802_v38, %v801_v36  ;;  %v808_v41 = vadd.f32 %v807_v39, %v806_v37 }
 0xa91   :  { %1763 = vlog2.f32 %v803_v40  ;;  %v809_v42 = vrot.slane %v808_v41, 1 }
 0xa93   :  { %v810_v45 = vadd.f32 %v809_v42, %v808_v41 }
 0xa95   :  { %1765 = vlog2.f32 %v810_v45 }
 0xa9e   :  { %v1764_v46 = vpop.eup %1763 }
 0xa9f   :  { %v812_v47 = vmul.f32 0.6931472, %v1764_v46 }
 0xaa1   :  { %v815_v48 = vadd.f32 %v812_v47, %v783_v4 }
 0xaa2   :  { %v1766_v49 = vpop.eup %1765 }
 0xaa3   :  { %v817_v50 = vsub.f32 %v2032_v20, %v815_v48  ;;  %v814_v53 = vmul.f32 0.6931472, %v1766_v49 }
 0xaa5   :  { %v816_v0 = vadd.f32 %v814_v53, %v790_v22  ;;  %v2201_v54 = vsel %vm837_vm11, %v2149_v8, %v817_v50 }
 0xaa6   :  { %v851_v55 = vrot.slane %v2201_v54, %v1974_v56 }
 0xaa7   :  { %v818_v58 = vsub.f32 %v2037_v23, %v816_v0 }
 0xaa8   :  { %v856_v59 = vadd.f32 %v851_v55, %v1955_v34 }
 0xaa9   :  { %v2210_v21 = vsel %vm837_vm11, %v2158_v13, %v818_v58  ;;  %vm1590_vm11 = vcmask 1024  }
 0xaaa   :  { %v858_v61 = vsel %vm224_vm2, %v856_v59, -inf  ;;  %v855_v57 = vrot.slane %v2210_v21, %v1974_v56 }
 0xaab   :  { %859 = vmax.xlane.f32.xlu1 %v858_v61 }
 0xaac   :  { %v857_v8 = vadd.f32 %v855_v57, %v1968_v52 }
 0xaae   :  { %v861_v5 = vsel %vm224_vm2, %v857_v8, -inf }
 0xaaf   :  { %862 = vmax.xlane.f32.xlu0 %v861_v5 }
 0xb34   :  { %v860_v7 = vpop.xlane.xlu1 %859 }
 0xb35   :  { %v864_v62 = vsub.f32 %v856_v59, %v860_v7 }
 0xb37   :  { %v866_v9 = vmul.f32 1.442695, %v864_v62 }
 0xb38   :  { %v863_v2 = vpop.xlane.xlu0 %862 }
 0xb39   :  { %1767 = vpow2.f32 %v866_v9  ;;  %v865_v10 = vsub.f32 %v857_v8, %v863_v2 }
 0xb3b   :  { %v868_v14 = vmul.f32 1.442695, %v865_v10 }
 0xb3d   :  { %1769 = vpow2.f32 %v868_v14 }
 0xb46   :  { %v1768_v13 = vpop.eup %1767 }
 0xb47   :  { %v870_v63 = vsel %vm224_vm2, %v1768_v13, 0.0 }
 0xb48   :  { %871 = vadd.xlane.f32.xlu0 %v870_v63 }
 0xb4a   :  { %v1770_v17 = vpop.eup %1769 }
 0xb4b   :  { %v873_v1 = vsel %vm224_vm2, %v1770_v17, 0.0 }
 0xb4c   :  { %826 = vadd.xlane.f32.xlu0 %v2189_v60  ;;  %874 = vadd.xlane.f32.xlu1 %v873_v1 }
 0xbd1   :  { %v872_v6 = vpop.xlane.xlu0 %871 }
 0xbd2   :  { %1771 = vlog2.f32 %v872_v6 }
 0xbd5   :  { %v875_v4 = vpop.xlane.xlu1 %874  ;;  %v827_v3 = vpop.xlane.xlu0 %826 }
 0xbd6   :  { %1773 = vlog2.f32 %v875_v4  ;;  %v828_v25 = vrot.slane %v827_v3, 4 }
 0xbd8   :  { %v829_v24 = vadd.f32 %v828_v25, %v827_v3 }
 0xbda   :  { %v830_v27 = vrot.slane %v829_v24, 2 }
 0xbdc   :  { %v831_v22 = vadd.f32 %v830_v27, %v829_v24 }
 0xbde   :  { %v832_v28 = vrot.slane %v831_v22, 1 }
 0xbdf   :  { %v1772_v15 = vpop.eup %1771 }
 0xbe0   :  { %v877_v29 = vmul.f32 0.6931472, %v1772_v15  ;;  %v833_v30 = vadd.f32 %v832_v28, %v831_v22 }
 0xbe2   :  { %1648 = vpush %v833_v30  ;;  %v880_v31 = vadd.f32 %v877_v29, %v860_v7 }
 0xbe3   :  { %v1774_v32 = vpop.eup %1773 }
 0xbe4   :  { %v879_v33 = vmul.f32 0.6931472, %v1774_v32  ;;  %v882_v60 = vsub.f32 %v2011_v16, %v880_v31 }
 0xbe6   :  { %886 = vperm.xlu1 %1669, %v882_v60   ;;  %v881_v26 = vadd.f32 %v879_v33, %v863_v2  ;;  %v938_v19 = vsub.f32 %v882_v60, %v2178_v51 }
 0xbe8   :  { %v883_v35 = vsub.f32 %v2013_v18, %v881_v26  ;;  %v940_v37 = vand.u32 2147483647, %v938_v19 }
 0xbea   :  { %891 = vperm.xlu0 %1670, %v883_v35   ;;  %v939_v36 = vsub.f32 %v883_v35, %v2185_v11  ;;  %v942_v39 = vsel %vm465_vm5, %v940_v37, 0.0 }
 0xbec   :  { %v941_v38 = vand.u32 2147483647, %v939_v36 }
 0xbee   :  { %v943_v40 = vsel %vm465_vm5, %v941_v38, 0.0 }
 0xbef   :  { %v2226_v41 = vadd.f32 %v943_v40, %v942_v39 }
 0xc13   :  { %s1649_s22 = spop %1648 }
 0xc14   :  { %v835_v42 = vstv %s1649_s22 }
 0xc15   :  { %v836_v45 = vmul.f32 0.0005, %v835_v42 }
 0xc17   :  { %vm844_vm12 = vcmp.lt.f32.partialorder %v836_v45, 0.1 }
 0xc18   :  { %v1622_v46 = vsel %vm844_vm12, 1.0, %v1915_v12 }
 0xc19   :  { %v2230_v47 = vmax.f32 %v2170_v43, %v1622_v46 }
 0xc1b   :  { %vm956_vm13 = vcmp.gt.f32.partialorder %v2230_v47, 0.0 }
 0xc1c   :  { %v2236_v48 = vsel %vm956_vm13, %v2178_v51, %v882_v60  ;;  %v2241_v49 = vsel %vm956_vm13, %v2185_v11, %v883_v35 }
 0xc61   :  { %v887_v50 = vpop.permute.xlu1 %886 }
 0xc62   :  { %v894_v53 = vadd.f32 %v887_v50, %v1955_v34 }
 0xc64   :  { %v896_v0 = vsel %vm224_vm2, %v894_v53, -inf }
 0xc65   :  { %v897_v55 = vrot.slane %v896_v0, 4  ;;  %v892_v43 = vpop.permute.xlu0 %891 }
 0xc66   :  { %v895_v58 = vadd.f32 %v892_v43, %v1968_v52 }
 0xc67   :  { %v898_v59 = vmax.f32 %v896_v0, %v897_v55 }
 0xc68   :  { %v903_v61 = vsel %vm224_vm2, %v895_v58, -inf }
 0xc69   :  { %v899_v57 = vrot.slane %v898_v59, 2  ;;  %v904_v51 = vrot.slane %v903_v61, 4 }
 0xc6b   :  { %v900_v8 = vmax.f32 %v898_v59, %v899_v57  ;;  %v905_v5 = vmax.f32 %v903_v61, %v904_v51 }
 0xc6d   :  { %v901_v7 = vrot.slane %v900_v8, 1  ;;  %v906_v62 = vrot.slane %v905_v5, 2 }
 0xc6f   :  { %v902_v11 = vmax.f32 %v900_v8, %v901_v7  ;;  %v907_v9 = vmax.f32 %v905_v5, %v906_v62 }
 0xc71   :  { %v910_v2 = vsub.f32 %v894_v53, %v902_v11  ;;  %v908_v10 = vrot.slane %v907_v9, 1 }
 0xc73   :  { %v912_v14 = vmul.f32 1.442695, %v910_v2  ;;  %v909_v13 = vmax.f32 %v907_v9, %v908_v10 }
 0xc75   :  { %1775 = vpow2.f32 %v912_v14  ;;  %v911_v63 = vsub.f32 %v895_v58, %v909_v13 }
 0xc77   :  { %v914_v17 = vmul.f32 1.442695, %v911_v63 }
 0xc79   :  { %1777 = vpow2.f32 %v914_v17 }
 0xc82   :  { %v1776_v1 = vpop.eup %1775 }
 0xc83   :  { %v916_v6 = vsel %vm224_vm2, %v1776_v1, 0.0 }
 0xc84   :  { %v917_v4 = vrot.slane %v916_v6, 4 }
 0xc86   :  { %v1778_v3 = vpop.eup %1777  ;;  %v918_v25 = vadd.f32 %v917_v4, %v916_v6 }
 0xc87   :  { %v923_v24 = vsel %vm224_vm2, %v1778_v3, 0.0 }
 0xc88   :  { %v919_v27 = vrot.slane %v918_v25, 2  ;;  %v924_v22 = vrot.slane %v923_v24, 4 }
 0xc8a   :  { %v920_v28 = vadd.f32 %v919_v27, %v918_v25  ;;  %v925_v15 = vadd.f32 %v924_v22, %v923_v24 }
 0xc8c   :  { %v921_v29 = vrot.slane %v920_v28, 1  ;;  %v926_v30 = vrot.slane %v925_v15, 2 }
 0xc8e   :  { %v922_v31 = vadd.f32 %v921_v29, %v920_v28  ;;  %v927_v32 = vadd.f32 %v926_v30, %v925_v15 }
 0xc90   :  { %1779 = vlog2.f32 %v922_v31  ;;  %v928_v33 = vrot.slane %v927_v32, 1 }
 0xc92   :  { %v929_v60 = vadd.f32 %v928_v33, %v927_v32 }
 0xc94   :  { %1781 = vlog2.f32 %v929_v60 }
 0xc9d   :  { %v1780_v26 = vpop.eup %1779 }
 0xc9e   :  { %v931_v19 = vmul.f32 0.6931472, %v1780_v26 }
 0xca0   :  { %v934_v35 = vadd.f32 %v931_v19, %v902_v11 }
 0xca1   :  { %v1782_v36 = vpop.eup %1781 }
 0xca2   :  { %v936_v37 = vsub.f32 %v2032_v20, %v934_v35  ;;  %v933_v38 = vmul.f32 0.6931472, %v1782_v36 }
 0xca4   :  { %v935_v39 = vadd.f32 %v933_v38, %v909_v13  ;;  %v2253_v40 = vsel %vm956_vm13, %v2201_v54, %v936_v37 }
 0xca5   :  { %v970_v42 = vrot.slane %v2253_v40, %v1974_v56 }
 0xca6   :  { %v937_v45 = vsub.f32 %v2037_v23, %v935_v39 }
 0xca7   :  { %v975_v46 = vadd.f32 %v970_v42, %v1955_v34 }
 0xca8   :  { %v2262_v50 = vsel %vm956_vm13, %v2210_v21, %v937_v45 }
 0xca9   :  { %v977_v53 = vsel %vm224_vm2, %v975_v46, -inf  ;;  %v974_v0 = vrot.slane %v2262_v50, %v1974_v56 }
 0xcaa   :  { %978 = vmax.xlane.f32.xlu1 %v977_v53 }
 0xcab   :  { %v976_v54 = vadd.f32 %v974_v0, %v1968_v52 }
 0xcad   :  { %v980_v55 = vsel %vm224_vm2, %v976_v54, -inf }
 0xcae   :  { %981 = vmax.xlane.f32.xlu0 %v980_v55 }
 0xd33   :  { %v979_v43 = vpop.xlane.xlu1 %978 }
 0xd34   :  { %v983_v58 = vsub.f32 %v975_v46, %v979_v43 }
 0xd36   :  { %v985_v59 = vmul.f32 1.442695, %v983_v58 }
 0xd37   :  { %v982_v61 = vpop.xlane.xlu0 %981 }
 0xd38   :  { %1783 = vpow2.f32 %v985_v59  ;;  %v984_v57 = vsub.f32 %v976_v54, %v982_v61 }
 0xd3a   :  { %v987_v51 = vmul.f32 1.442695, %v984_v57 }
 0xd3c   :  { %1785 = vpow2.f32 %v987_v51 }
 0xd45   :  { %v1784_v21 = vpop.eup %1783 }
 0xd46   :  { %v989_v8 = vsel %vm224_vm2, %v1784_v21, 0.0 }
 0xd47   :  { %990 = vadd.xlane.f32.xlu1 %v989_v8 }
 0xd49   :  { %v1786_v5 = vpop.eup %1785 }
 0xd4a   :  { %v992_v7 = vsel %vm224_vm2, %v1786_v5, 0.0 }
 0xd4b   :  { %945 = vadd.xlane.f32.xlu1 %v2226_v41  ;;  %993 = vadd.xlane.f32.xlu0 %v992_v7 }
 0xdd0   :  { %v991_v62 = vpop.xlane.xlu1 %990 }
 0xdd1   :  { %1787 = vlog2.f32 %v991_v62 }
 0xdd4   :  { %v946_v11 = vpop.xlane.xlu1 %945  ;;  %v994_v9 = vpop.xlane.xlu0 %993 }
 0xdd5   :  { %v947_v2 = vrot.slane %v946_v11, 4  ;;  %1789 = vlog2.f32 %v994_v9 }
 0xdd7   :  { %v948_v10 = vadd.f32 %v947_v2, %v946_v11 }
 0xdd9   :  { %v949_v14 = vrot.slane %v948_v10, 2 }
 0xddb   :  { %v950_v13 = vadd.f32 %v949_v14, %v948_v10 }
 0xddd   :  { %v951_v63 = vrot.slane %v950_v13, 1 }
 0xdde   :  { %v1788_v17 = vpop.eup %1787 }
 0xddf   :  { %v996_v1 = vmul.f32 0.6931472, %v1788_v17  ;;  %v952_v6 = vadd.f32 %v951_v63, %v950_v13 }
 0xde1   :  { %1650 = vpush %v952_v6  ;;  %v999_v4 = vadd.f32 %v996_v1, %v979_v43 }
 0xde2   :  { %v1790_v3 = vpop.eup %1789 }
 0xde3   :  { %v998_v25 = vmul.f32 0.6931472, %v1790_v3  ;;  %v1001_v41 = vsub.f32 %v2011_v16, %v999_v4 }
 0xde5   :  { %1005 = vperm.xlu0 %1670, %v1001_v41   ;;  %v1000_v24 = vadd.f32 %v998_v25, %v982_v61  ;;  %v1057_v27 = vsub.f32 %v1001_v41, %v2236_v48 }
 0xde7   :  { %v1002_v22 = vsub.f32 %v2013_v18, %v1000_v24  ;;  %v1059_v15 = vand.u32 2147483647, %v1057_v27 }
 0xde9   :  { %1010 = vperm.xlu1 %1669, %v1002_v22   ;;  %v1058_v28 = vsub.f32 %v1002_v22, %v2241_v49  ;;  %v1061_v30 = vsel %vm465_vm5, %v1059_v15, 0.0 }
 0xdeb   :  { %v1060_v29 = vand.u32 2147483647, %v1058_v28 }
 0xded   :  { %v1062_v31 = vsel %vm465_vm5, %v1060_v29, 0.0 }
 0xdee   :  { %v2278_v32 = vadd.f32 %v1062_v31, %v1061_v30 }
 0xe12   :  { %s1651_s23 = spop %1650 }
 0xe13   :  { %v954_v33 = vstv %s1651_s23 }
 0xe14   :  { %v955_v60 = vmul.f32 0.0005, %v954_v33 }
 0xe16   :  { %vm963_vm14 = vcmp.lt.f32.partialorder %v955_v60, 0.1 }
 0xe17   :  { %v1623_v26 = vsel %vm963_vm14, 1.0, %v1915_v12 }
 0xe18   :  { %v2282_v19 = vmax.f32 %v2230_v47, %v1623_v26 }
 0xe1a   :  { %vm1075_vm15 = vcmp.gt.f32.partialorder %v2282_v19, 0.0 }
 0xe1b   :  { %v2288_v35 = vsel %vm1075_vm15, %v2236_v48, %v1001_v41  ;;  %v2293_v36 = vsel %vm1075_vm15, %v2241_v49, %v1002_v22 }
 0xe60   :  { %v1006_v37 = vpop.permute.xlu0 %1005 }
 0xe61   :  { %v1013_v38 = vadd.f32 %v1006_v37, %v1955_v34 }
 0xe63   :  { %v1015_v39 = vsel %vm224_vm2, %v1013_v38, -inf }
 0xe64   :  { %v1016_v42 = vrot.slane %v1015_v39, 4  ;;  %v1011_v47 = vpop.permute.xlu1 %1010 }
 0xe65   :  { %v1014_v45 = vadd.f32 %v1011_v47, %v1968_v52 }
 0xe66   :  { %v1017_v46 = vmax.f32 %v1015_v39, %v1016_v42 }
 0xe67   :  { %v1022_v53 = vsel %vm224_vm2, %v1014_v45, -inf }
 0xe68   :  { %v1018_v0 = vrot.slane %v1017_v46, 2  ;;  %v1023_v48 = vrot.slane %v1022_v53, 4 }
 0xe6a   :  { %v1019_v54 = vmax.f32 %v1017_v46, %v1018_v0  ;;  %v1024_v55 = vmax.f32 %v1022_v53, %v1023_v48 }
 0xe6c   :  { %v1020_v43 = vrot.slane %v1019_v54, 1  ;;  %v1025_v58 = vrot.slane %v1024_v55, 2 }
 0xe6e   :  { %v1021_v49 = vmax.f32 %v1019_v54, %v1020_v43  ;;  %v1026_v59 = vmax.f32 %v1024_v55, %v1025_v58 }
 0xe70   :  { %v1029_v61 = vsub.f32 %v1013_v38, %v1021_v49  ;;  %v1027_v57 = vrot.slane %v1026_v59, 1 }
 0xe72   :  { %v1031_v51 = vmul.f32 1.442695, %v1029_v61  ;;  %v1028_v21 = vmax.f32 %v1026_v59, %v1027_v57 }
 0xe74   :  { %1791 = vpow2.f32 %v1031_v51  ;;  %v1030_v8 = vsub.f32 %v1014_v45, %v1028_v21 }
 0xe76   :  { %v1033_v5 = vmul.f32 1.442695, %v1030_v8 }
 0xe78   :  { %1793 = vpow2.f32 %v1033_v5 }
 0xe81   :  { %v1792_v7 = vpop.eup %1791 }
 0xe82   :  { %v1035_v62 = vsel %vm224_vm2, %v1792_v7, 0.0 }
 0xe83   :  { %v1036_v11 = vrot.slane %v1035_v62, 4 }
 0xe85   :  { %v1794_v9 = vpop.eup %1793  ;;  %v1037_v2 = vadd.f32 %v1036_v11, %v1035_v62 }
 0xe86   :  { %v1042_v10 = vsel %vm224_vm2, %v1794_v9, 0.0 }
 0xe87   :  { %v1038_v14 = vrot.slane %v1037_v2, 2  ;;  %v1043_v13 = vrot.slane %v1042_v10, 4 }
 0xe89   :  { %v1039_v63 = vadd.f32 %v1038_v14, %v1037_v2  ;;  %v1044_v17 = vadd.f32 %v1043_v13, %v1042_v10 }
 0xe8b   :  { %v1040_v1 = vrot.slane %v1039_v63, 1  ;;  %v1045_v6 = vrot.slane %v1044_v17, 2 }
 0xe8d   :  { %v1041_v4 = vadd.f32 %v1040_v1, %v1039_v63  ;;  %v1046_v3 = vadd.f32 %v1045_v6, %v1044_v17 }
 0xe8f   :  { %1795 = vlog2.f32 %v1041_v4  ;;  %v1047_v25 = vrot.slane %v1046_v3, 1 }
 0xe91   :  { %v1048_v41 = vadd.f32 %v1047_v25, %v1046_v3 }
 0xe93   :  { %1797 = vlog2.f32 %v1048_v41 }
 0xe9c   :  { %v1796_v24 = vpop.eup %1795 }
 0xe9d   :  { %v1050_v27 = vmul.f32 0.6931472, %v1796_v24 }
 0xe9f   :  { %v1053_v22 = vadd.f32 %v1050_v27, %v1021_v49 }
 0xea0   :  { %v1798_v28 = vpop.eup %1797 }
 0xea1   :  { %v1055_v15 = vsub.f32 %v2032_v20, %v1053_v22  ;;  %v1052_v29 = vmul.f32 0.6931472, %v1798_v28 }
 0xea3   :  { %v1054_v30 = vadd.f32 %v1052_v29, %v1028_v21  ;;  %v2305_v31 = vsel %vm1075_vm15, %v2253_v40, %v1055_v15 }
 0xea4   :  { %v1089_v33 = vrot.slane %v2305_v31, %v1974_v56 }
 0xea5   :  { %v1056_v60 = vsub.f32 %v2037_v23, %v1054_v30 }
 0xea6   :  { %v1094_v26 = vadd.f32 %v1089_v33, %v1955_v34 }
 0xea7   :  { %v2314_v37 = vsel %vm1075_vm15, %v2262_v50, %v1056_v60 }
 0xea8   :  { %v1096_v38 = vsel %vm224_vm2, %v1094_v26, -inf  ;;  %v1093_v39 = vrot.slane %v2314_v37, %v1974_v56 }
 0xea9   :  { %1097 = vmax.xlane.f32.xlu1 %v1096_v38 }
 0xeaa   :  { %v1095_v40 = vadd.f32 %v1093_v39, %v1968_v52 }
 0xeac   :  { %v1099_v42 = vsel %vm224_vm2, %v1095_v40, -inf }
 0xead   :  { %1100 = vmax.xlane.f32.xlu0 %v1099_v42 }
 0xf32   :  { %v1098_v47 = vpop.xlane.xlu1 %1097 }
 0xf33   :  { %v1102_v45 = vsub.f32 %v1094_v26, %v1098_v47 }
 0xf35   :  { %v1104_v46 = vmul.f32 1.442695, %v1102_v45 }
 0xf36   :  { %v1101_v53 = vpop.xlane.xlu0 %1100 }
 0xf37   :  { %1799 = vpow2.f32 %v1104_v46  ;;  %v1103_v0 = vsub.f32 %v1095_v40, %v1101_v53 }
 0xf39   :  { %v1106_v48 = vmul.f32 1.442695, %v1103_v0 }
 0xf3b   :  { %1801 = vpow2.f32 %v1106_v48 }
 0xf44   :  { %v1800_v50 = vpop.eup %1799 }
 0xf45   :  { %v1108_v54 = vsel %vm224_vm2, %v1800_v50, 0.0 }
 0xf46   :  { %1109 = vadd.xlane.f32.xlu0 %v1108_v54 }
 0xf48   :  { %v1802_v55 = vpop.eup %1801 }
 0xf49   :  { %v1111_v43 = vsel %vm224_vm2, %v1802_v55, 0.0 }
 0xf4a   :  { %1064 = vadd.xlane.f32.xlu0 %v2278_v32  ;;  %1112 = vadd.xlane.f32.xlu1 %v1111_v43 }
 0xfcf   :  { %v1110_v58 = vpop.xlane.xlu0 %1109 }
 0xfd0   :  { %1803 = vlog2.f32 %v1110_v58 }
 0xfd3   :  { %v1113_v49 = vpop.xlane.xlu1 %1112  ;;  %v1065_v59 = vpop.xlane.xlu0 %1064 }
 0xfd4   :  { %1805 = vlog2.f32 %v1113_v49  ;;  %v1066_v61 = vrot.slane %v1065_v59, 4 }
 0xfd6   :  { %v1067_v57 = vadd.f32 %v1066_v61, %v1065_v59 }
 0xfd8   :  { %v1068_v51 = vrot.slane %v1067_v57, 2 }
 0xfda   :  { %v1069_v21 = vadd.f32 %v1068_v51, %v1067_v57 }
 0xfdc   :  { %v1070_v8 = vrot.slane %v1069_v21, 1 }
 0xfdd   :  { %v1804_v5 = vpop.eup %1803 }
 0xfde   :  { %v1115_v7 = vmul.f32 0.6931472, %v1804_v5  ;;  %v1071_v62 = vadd.f32 %v1070_v8, %v1069_v21 }
 0xfe0   :  { %1652 = vpush %v1071_v62  ;;  %v1118_v11 = vadd.f32 %v1115_v7, %v1098_v47 }
 0xfe1   :  { %v1806_v9 = vpop.eup %1805 }
 0xfe2   :  { %v1117_v2 = vmul.f32 0.6931472, %v1806_v9  ;;  %v1120_v32 = vsub.f32 %v2011_v16, %v1118_v11 }
 0xfe4   :  { %1124 = vperm.xlu1 %1669, %v1120_v32   ;;  %v1119_v10 = vadd.f32 %v1117_v2, %v1101_v53  ;;  %v1176_v14 = vsub.f32 %v1120_v32, %v2288_v35 }
 0xfe6   :  { %v1121_v13 = vsub.f32 %v2013_v18, %v1119_v10  ;;  %v1178_v17 = vand.u32 2147483647, %v1176_v14 }
 0xfe8   :  { %1129 = vperm.xlu0 %1670, %v1121_v13   ;;  %v1177_v63 = vsub.f32 %v1121_v13, %v2293_v36  ;;  %v1180_v6 = vsel %vm465_vm5, %v1178_v17, 0.0 }
 0xfea   :  { %v1179_v1 = vand.u32 2147483647, %v1177_v63 }
 0xfec   :  { %v1181_v4 = vsel %vm465_vm5, %v1179_v1, 0.0 }
 0xfed   :  { %v2330_v3 = vadd.f32 %v1181_v4, %v1180_v6 }
0x1011   :  { %s1653_s24 = spop %1652 }
0x1012   :  { %v1073_v25 = vstv %s1653_s24 }
0x1013   :  { %v1074_v41 = vmul.f32 0.0005, %v1073_v25 }
0x1015   :  { %vm1082_vm0 = vcmp.lt.f32.partialorder %v1074_v41, 0.1 }
0x1016   :  { %v1624_v24 = vsel %vm1082_vm0, 1.0, %v1915_v12 }
0x1017   :  { %v2334_v27 = vmax.f32 %v2282_v19, %v1624_v24 }
0x1019   :  { %vm1194_vm1 = vcmp.gt.f32.partialorder %v2334_v27, 0.0 }
0x101a   :  { %v2340_v22 = vsel %vm1194_vm1, %v2288_v35, %v1120_v32  ;;  %v2345_v28 = vsel %vm1194_vm1, %v2293_v36, %v1121_v13 }
0x105f   :  { %v1125_v15 = vpop.permute.xlu1 %1124 }
0x1060   :  { %v1132_v29 = vadd.f32 %v1125_v15, %v1955_v34 }
0x1062   :  { %v1134_v30 = vsel %vm224_vm2, %v1132_v29, -inf }
0x1063   :  { %v1135_v33 = vrot.slane %v1134_v30, 4  ;;  %v1130_v19 = vpop.permute.xlu0 %1129 }
0x1064   :  { %v1133_v60 = vadd.f32 %v1130_v19, %v1968_v52 }
0x1065   :  { %v1136_v26 = vmax.f32 %v1134_v30, %v1135_v33 }
0x1066   :  { %v1141_v38 = vsel %vm224_vm2, %v1133_v60, -inf }
0x1067   :  { %v1137_v39 = vrot.slane %v1136_v26, 2  ;;  %v1142_v35 = vrot.slane %v1141_v38, 4 }
0x1069   :  { %v1138_v40 = vmax.f32 %v1136_v26, %v1137_v39  ;;  %v1143_v42 = vmax.f32 %v1141_v38, %v1142_v35 }
0x106b   :  { %v1139_v47 = vrot.slane %v1138_v40, 1  ;;  %v1144_v45 = vrot.slane %v1143_v42, 2 }
0x106d   :  { %v1140_v36 = vmax.f32 %v1138_v40, %v1139_v47  ;;  %v1145_v46 = vmax.f32 %v1143_v42, %v1144_v45 }
0x106f   :  { %v1148_v53 = vsub.f32 %v1132_v29, %v1140_v36  ;;  %v1146_v0 = vrot.slane %v1145_v46, 1 }
0x1071   :  { %v1150_v48 = vmul.f32 1.442695, %v1148_v53  ;;  %v1147_v50 = vmax.f32 %v1145_v46, %v1146_v0 }
0x1073   :  { %1807 = vpow2.f32 %v1150_v48  ;;  %v1149_v54 = vsub.f32 %v1133_v60, %v1147_v50 }
0x1075   :  { %v1152_v55 = vmul.f32 1.442695, %v1149_v54 }
0x1077   :  { %1809 = vpow2.f32 %v1152_v55 }
0x1080   :  { %v1808_v43 = vpop.eup %1807 }
0x1081   :  { %v1154_v58 = vsel %vm224_vm2, %v1808_v43, 0.0 }
0x1082   :  { %v1155_v49 = vrot.slane %v1154_v58, 4 }
0x1084   :  { %v1810_v59 = vpop.eup %1809  ;;  %v1156_v61 = vadd.f32 %v1155_v49, %v1154_v58 }
0x1085   :  { %v1161_v57 = vsel %vm224_vm2, %v1810_v59, 0.0 }
0x1086   :  { %v1157_v51 = vrot.slane %v1156_v61, 2  ;;  %v1162_v21 = vrot.slane %v1161_v57, 4 }
0x1088   :  { %v1158_v8 = vadd.f32 %v1157_v51, %v1156_v61  ;;  %v1163_v5 = vadd.f32 %v1162_v21, %v1161_v57 }
0x108a   :  { %v1159_v7 = vrot.slane %v1158_v8, 1  ;;  %v1164_v62 = vrot.slane %v1163_v5, 2 }
0x108c   :  { %v1160_v11 = vadd.f32 %v1159_v7, %v1158_v8  ;;  %v1165_v9 = vadd.f32 %v1164_v62, %v1163_v5 }
0x108e   :  { %1811 = vlog2.f32 %v1160_v11  ;;  %v1166_v2 = vrot.slane %v1165_v9, 1 }
0x1090   :  { %v1167_v32 = vadd.f32 %v1166_v2, %v1165_v9 }
0x1092   :  { %1813 = vlog2.f32 %v1167_v32 }
0x109b   :  { %v1812_v10 = vpop.eup %1811 }
0x109c   :  { %v1169_v14 = vmul.f32 0.6931472, %v1812_v10 }
0x109e   :  { %v1172_v13 = vadd.f32 %v1169_v14, %v1140_v36 }
0x109f   :  { %v1814_v63 = vpop.eup %1813 }
0x10a0   :  { %v1174_v17 = vsub.f32 %v2032_v20, %v1172_v13  ;;  %v1171_v1 = vmul.f32 0.6931472, %v1814_v63 }
0x10a2   :  { %v1173_v6 = vadd.f32 %v1171_v1, %v1147_v50  ;;  %v2357_v4 = vsel %vm1194_vm1, %v2305_v31, %v1174_v17 }
0x10a3   :  { %v1208_v25 = vrot.slane %v2357_v4, %v1974_v56 }
0x10a4   :  { %v1175_v41 = vsub.f32 %v2037_v23, %v1173_v6 }
0x10a5   :  { %v1213_v24 = vadd.f32 %v1208_v25, %v1955_v34 }
0x10a6   :  { %v2366_v15 = vsel %vm1194_vm1, %v2314_v37, %v1175_v41 }
0x10a7   :  { %v1215_v29 = vsel %vm224_vm2, %v1213_v24, -inf  ;;  %v1212_v30 = vrot.slane %v2366_v15, %v1974_v56 }
0x10a8   :  { %1216 = vmax.xlane.f32.xlu1 %v1215_v29 }
0x10a9   :  { %v1214_v31 = vadd.f32 %v1212_v30, %v1968_v52 }
0x10ab   :  { %v1218_v33 = vsel %vm224_vm2, %v1214_v31, -inf }
0x10ac   :  { %1219 = vmax.xlane.f32.xlu0 %v1218_v33 }
0x1131   :  { %v1217_v19 = vpop.xlane.xlu1 %1216 }
0x1132   :  { %v1221_v60 = vsub.f32 %v1213_v24, %v1217_v19 }
0x1134   :  { %v1223_v26 = vmul.f32 1.442695, %v1221_v60 }
0x1135   :  { %v1220_v38 = vpop.xlane.xlu0 %1219 }
0x1136   :  { %1815 = vpow2.f32 %v1223_v26  ;;  %v1222_v39 = vsub.f32 %v1214_v31, %v1220_v38 }
0x1138   :  { %v1225_v35 = vmul.f32 1.442695, %v1222_v39 }
0x113a   :  { %1817 = vpow2.f32 %v1225_v35 }
0x1143   :  { %v1816_v37 = vpop.eup %1815 }
0x1144   :  { %v1227_v40 = vsel %vm224_vm2, %v1816_v37, 0.0 }
0x1145   :  { %1228 = vadd.xlane.f32.xlu1 %v1227_v40 }
0x1147   :  { %v1818_v42 = vpop.eup %1817 }
0x1148   :  { %v1230_v47 = vsel %vm224_vm2, %v1818_v42, 0.0 }
0x1149   :  { %1183 = vadd.xlane.f32.xlu1 %v2330_v3  ;;  %1231 = vadd.xlane.f32.xlu0 %v1230_v47 }
0x11ce   :  { %v1229_v45 = vpop.xlane.xlu1 %1228 }
0x11cf   :  { %1819 = vlog2.f32 %v1229_v45 }
0x11d2   :  { %v1184_v36 = vpop.xlane.xlu1 %1183  ;;  %v1232_v46 = vpop.xlane.xlu0 %1231 }
0x11d3   :  { %v1185_v53 = vrot.slane %v1184_v36, 4  ;;  %1821 = vlog2.f32 %v1232_v46 }
0x11d5   :  { %v1186_v0 = vadd.f32 %v1185_v53, %v1184_v36 }
0x11d7   :  { %v1187_v48 = vrot.slane %v1186_v0, 2 }
0x11d9   :  { %v1188_v50 = vadd.f32 %v1187_v48, %v1186_v0 }
0x11db   :  { %v1189_v54 = vrot.slane %v1188_v50, 1 }
0x11dc   :  { %v1820_v55 = vpop.eup %1819 }
0x11dd   :  { %v1234_v43 = vmul.f32 0.6931472, %v1820_v55  ;;  %v1190_v58 = vadd.f32 %v1189_v54, %v1188_v50 }
0x11df   :  { %1654 = vpush %v1190_v58  ;;  %v1237_v49 = vadd.f32 %v1234_v43, %v1217_v19 }
0x11e0   :  { %v1822_v59 = vpop.eup %1821 }
0x11e1   :  { %v1236_v61 = vmul.f32 0.6931472, %v1822_v59  ;;  %v1239_v3 = vsub.f32 %v2011_v16, %v1237_v49 }
0x11e3   :  { %1243 = vperm.xlu0 %1670, %v1239_v3   ;;  %v1238_v57 = vadd.f32 %v1236_v61, %v1220_v38  ;;  %v1295_v51 = vsub.f32 %v1239_v3, %v2340_v22 }
0x11e5   :  { %v1240_v21 = vsub.f32 %v2013_v18, %v1238_v57  ;;  %v1297_v5 = vand.u32 2147483647, %v1295_v51 }
0x11e7   :  { %1248 = vperm.xlu1 %1669, %v1240_v21   ;;  %v1296_v8 = vsub.f32 %v1240_v21, %v2345_v28  ;;  %v1299_v62 = vsel %vm465_vm5, %v1297_v5, 0.0 }
0x11e9   :  { %v1298_v7 = vand.u32 2147483647, %v1296_v8 }
0x11eb   :  { %v1300_v11 = vsel %vm465_vm5, %v1298_v7, 0.0 }
0x11ec   :  { %v2382_v9 = vadd.f32 %v1300_v11, %v1299_v62 }
0x1210   :  { %s1655_s25 = spop %1654 }
0x1211   :  { %v1192_v2 = vstv %s1655_s25 }
0x1212   :  { %v1193_v32 = vmul.f32 0.0005, %v1192_v2 }
0x1214   :  { %vm1201_vm6 = vcmp.lt.f32.partialorder %v1193_v32, 0.1 }
0x1215   :  { %v1625_v10 = vsel %vm1201_vm6, 1.0, %v1915_v12 }
0x1216   :  { %v2386_v14 = vmax.f32 %v2334_v27, %v1625_v10 }
0x1218   :  { %vm1313_vm7 = vcmp.gt.f32.partialorder %v2386_v14, 0.0 }
0x1219   :  { %v2392_v13 = vsel %vm1313_vm7, %v2340_v22, %v1239_v3  ;;  %v2397_v63 = vsel %vm1313_vm7, %v2345_v28, %v1240_v21 }
0x125e   :  { %v1244_v17 = vpop.permute.xlu0 %1243 }
0x125f   :  { %v1251_v1 = vadd.f32 %v1244_v17, %v1955_v34 }
0x1261   :  { %v1253_v6 = vsel %vm224_vm2, %v1251_v1, -inf }
0x1262   :  { %v1254_v25 = vrot.slane %v1253_v6, 4  ;;  %v1249_v27 = vpop.permute.xlu1 %1248 }
0x1263   :  { %v1252_v41 = vadd.f32 %v1249_v27, %v1968_v52 }
0x1264   :  { %v1255_v24 = vmax.f32 %v1253_v6, %v1254_v25 }
0x1265   :  { %v1260_v29 = vsel %vm224_vm2, %v1252_v41, -inf }
0x1266   :  { %v1256_v30 = vrot.slane %v1255_v24, 2  ;;  %v1261_v22 = vrot.slane %v1260_v29, 4 }
0x1268   :  { %v1257_v31 = vmax.f32 %v1255_v24, %v1256_v30  ;;  %v1262_v33 = vmax.f32 %v1260_v29, %v1261_v22 }
0x126a   :  { %v1258_v19 = vrot.slane %v1257_v31, 1  ;;  %v1263_v60 = vrot.slane %v1262_v33, 2 }
0x126c   :  { %v1259_v28 = vmax.f32 %v1257_v31, %v1258_v19  ;;  %v1264_v26 = vmax.f32 %v1262_v33, %v1263_v60 }
0x126e   :  { %v1267_v38 = vsub.f32 %v1251_v1, %v1259_v28  ;;  %v1265_v39 = vrot.slane %v1264_v26, 1 }
0x1270   :  { %v1269_v35 = vmul.f32 1.442695, %v1267_v38  ;;  %v1266_v37 = vmax.f32 %v1264_v26, %v1265_v39 }
0x1272   :  { %1823 = vpow2.f32 %v1269_v35  ;;  %v1268_v40 = vsub.f32 %v1252_v41, %v1266_v37 }
0x1274   :  { %v1271_v42 = vmul.f32 1.442695, %v1268_v40 }
0x1276   :  { %1825 = vpow2.f32 %v1271_v42 }
0x127f   :  { %v1824_v47 = vpop.eup %1823 }
0x1280   :  { %v1273_v45 = vsel %vm224_vm2, %v1824_v47, 0.0 }
0x1281   :  { %v1274_v36 = vrot.slane %v1273_v45, 4 }
0x1283   :  { %v1826_v46 = vpop.eup %1825  ;;  %v1275_v53 = vadd.f32 %v1274_v36, %v1273_v45 }
0x1284   :  { %v1280_v0 = vsel %vm224_vm2, %v1826_v46, 0.0 }
0x1285   :  { %v1276_v48 = vrot.slane %v1275_v53, 2  ;;  %v1281_v50 = vrot.slane %v1280_v0, 4 }
0x1287   :  { %v1277_v54 = vadd.f32 %v1276_v48, %v1275_v53  ;;  %v1282_v55 = vadd.f32 %v1281_v50, %v1280_v0 }
0x1289   :  { %v1278_v43 = vrot.slane %v1277_v54, 1  ;;  %v1283_v58 = vrot.slane %v1282_v55, 2 }
0x128b   :  { %v1279_v49 = vadd.f32 %v1278_v43, %v1277_v54  ;;  %v1284_v59 = vadd.f32 %v1283_v58, %v1282_v55 }
0x128d   :  { %1827 = vlog2.f32 %v1279_v49  ;;  %v1285_v61 = vrot.slane %v1284_v59, 1 }
0x128f   :  { %v1286_v3 = vadd.f32 %v1285_v61, %v1284_v59 }
0x1291   :  { %1829 = vlog2.f32 %v1286_v3 }
0x129a   :  { %v1828_v57 = vpop.eup %1827 }
0x129b   :  { %v1288_v51 = vmul.f32 0.6931472, %v1828_v57 }
0x129d   :  { %v1291_v21 = vadd.f32 %v1288_v51, %v1259_v28 }
0x129e   :  { %v1830_v8 = vpop.eup %1829 }
0x129f   :  { %v1293_v5 = vsub.f32 %v2032_v20, %v1291_v21  ;;  %v1290_v7 = vmul.f32 0.6931472, %v1830_v8 }
0x12a1   :  { %v1292_v62 = vadd.f32 %v1290_v7, %v1266_v37  ;;  %v2409_v11 = vsel %vm1313_vm7, %v2357_v4, %v1293_v5 }
0x12a2   :  { %v1327_v2 = vrot.slane %v2409_v11, %v1974_v56 }
0x12a3   :  { %v1294_v32 = vsub.f32 %v2037_v23, %v1292_v62 }
0x12a4   :  { %v1332_v10 = vadd.f32 %v1327_v2, %v1955_v34 }
0x12a5   :  { %v2418_v17 = vsel %vm1313_vm7, %v2366_v15, %v1294_v32 }
0x12a6   :  { %v1334_v1 = vsel %vm224_vm2, %v1332_v10, -inf  ;;  %v1331_v6 = vrot.slane %v2418_v17, %v1974_v56 }
0x12a7   :  { %1335 = vmax.xlane.f32.xlu1 %v1334_v1 }
0x12a8   :  { %v1333_v4 = vadd.f32 %v1331_v6, %v1968_v52 }
0x12aa   :  { %v1337_v25 = vsel %vm224_vm2, %v1333_v4, -inf }
0x12ab   :  { %1338 = vmax.xlane.f32.xlu0 %v1337_v25 }
0x1330   :  { %v1336_v27 = vpop.xlane.xlu1 %1335 }
0x1331   :  { %v1340_v41 = vsub.f32 %v1332_v10, %v1336_v27 }
0x1333   :  { %v1342_v24 = vmul.f32 1.442695, %v1340_v41 }
0x1334   :  { %v1339_v29 = vpop.xlane.xlu0 %1338 }
0x1335   :  { %1831 = vpow2.f32 %v1342_v24  ;;  %v1341_v30 = vsub.f32 %v1333_v4, %v1339_v29 }
0x1337   :  { %v1344_v22 = vmul.f32 1.442695, %v1341_v30 }
0x1339   :  { %1833 = vpow2.f32 %v1344_v22 }
0x1342   :  { %v1832_v15 = vpop.eup %1831 }
0x1343   :  { %v1346_v31 = vsel %vm224_vm2, %v1832_v15, 0.0 }
0x1344   :  { %1347 = vadd.xlane.f32.xlu0 %v1346_v31 }
0x1346   :  { %v1834_v33 = vpop.eup %1833 }
0x1347   :  { %v1349_v19 = vsel %vm224_vm2, %v1834_v33, 0.0 }
0x1348   :  { %1302 = vadd.xlane.f32.xlu0 %v2382_v9  ;;  %1350 = vadd.xlane.f32.xlu1 %v1349_v19 }
0x13cd   :  { %v1348_v60 = vpop.xlane.xlu0 %1347 }
0x13ce   :  { %1835 = vlog2.f32 %v1348_v60 }
0x13d1   :  { %v1351_v28 = vpop.xlane.xlu1 %1350  ;;  %v1303_v26 = vpop.xlane.xlu0 %1302 }
0x13d2   :  { %1837 = vlog2.f32 %v1351_v28  ;;  %v1304_v38 = vrot.slane %v1303_v26, 4 }
0x13d4   :  { %v1305_v39 = vadd.f32 %v1304_v38, %v1303_v26 }
0x13d6   :  { %v1306_v35 = vrot.slane %v1305_v39, 2 }
0x13d8   :  { %v1307_v37 = vadd.f32 %v1306_v35, %v1305_v39 }
0x13da   :  { %v1308_v40 = vrot.slane %v1307_v37, 1 }
0x13db   :  { %v1836_v42 = vpop.eup %1835 }
0x13dc   :  { %v1353_v47 = vmul.f32 0.6931472, %v1836_v42  ;;  %v1309_v45 = vadd.f32 %v1308_v40, %v1307_v37 }
0x13de   :  { %1656 = vpush %v1309_v45  ;;  %v1356_v36 = vadd.f32 %v1353_v47, %v1336_v27 }
0x13df   :  { %v1838_v46 = vpop.eup %1837 }
0x13e0   :  { %v1355_v53 = vmul.f32 0.6931472, %v1838_v46  ;;  %v1358_v9 = vsub.f32 %v2011_v16, %v1356_v36 }
0x13e2   :  { %1362 = vperm.xlu1 %1669, %v1358_v9   ;;  %v1357_v0 = vadd.f32 %v1355_v53, %v1339_v29  ;;  %v1414_v48 = vsub.f32 %v1358_v9, %v2392_v13 }
0x13e4   :  { %v1359_v50 = vsub.f32 %v2013_v18, %v1357_v0  ;;  %v1416_v55 = vand.u32 2147483647, %v1414_v48 }
0x13e6   :  { %1367 = vperm.xlu0 %1670, %v1359_v50   ;;  %v1415_v54 = vsub.f32 %v1359_v50, %v2397_v63  ;;  %v1418_v58 = vsel %vm465_vm5, %v1416_v55, 0.0 }
0x13e8   :  { %v1417_v43 = vand.u32 2147483647, %v1415_v54 }
0x13ea   :  { %v1419_v49 = vsel %vm465_vm5, %v1417_v43, 0.0 }
0x13eb   :  { %v2434_v59 = vadd.f32 %v1419_v49, %v1418_v58 }
0x140f   :  { %s1657_s26 = spop %1656 }
0x1410   :  { %v1311_v61 = vstv %s1657_s26 }
0x1411   :  { %v1312_v3 = vmul.f32 0.0005, %v1311_v61 }
0x1413   :  { %vm1320_vm8 = vcmp.lt.f32.partialorder %v1312_v3, 0.1 }
0x1414   :  { %v1626_v57 = vsel %vm1320_vm8, 1.0, %v1915_v12 }
0x1415   :  { %v2438_v51 = vmax.f32 %v2386_v14, %v1626_v57 }
0x1417   :  { %vm1432_vm9 = vcmp.gt.f32.partialorder %v2438_v51, 0.0 }
0x1418   :  { %v2444_v21 = vsel %vm1432_vm9, %v2392_v13, %v1358_v9  ;;  %v2449_v8 = vsel %vm1432_vm9, %v2397_v63, %v1359_v50 }
0x145d   :  { %v1363_v5 = vpop.permute.xlu1 %1362 }
0x145e   :  { %v1370_v7 = vadd.f32 %v1363_v5, %v1955_v34 }
0x1460   :  { %v1372_v62 = vsel %vm224_vm2, %v1370_v7, -inf }
0x1461   :  { %v1373_v2 = vrot.slane %v1372_v62, 4  ;;  %v1368_v14 = vpop.permute.xlu0 %1367 }
0x1462   :  { %v1371_v32 = vadd.f32 %v1368_v14, %v1968_v52 }
0x1463   :  { %v1374_v10 = vmax.f32 %v1372_v62, %v1373_v2 }
0x1464   :  { %v1379_v1 = vsel %vm224_vm2, %v1371_v32, -inf }
0x1465   :  { %v1375_v6 = vrot.slane %v1374_v10, 2  ;;  %v1380_v13 = vrot.slane %v1379_v1, 4 }
0x1467   :  { %v1376_v4 = vmax.f32 %v1374_v10, %v1375_v6  ;;  %v1381_v25 = vmax.f32 %v1379_v1, %v1380_v13 }
0x1469   :  { %v1377_v27 = vrot.slane %v1376_v4, 1  ;;  %v1382_v41 = vrot.slane %v1381_v25, 2 }
0x146b   :  { %v1378_v63 = vmax.f32 %v1376_v4, %v1377_v27  ;;  %v1383_v24 = vmax.f32 %v1381_v25, %v1382_v41 }
0x146d   :  { %v1386_v29 = vsub.f32 %v1370_v7, %v1378_v63  ;;  %v1384_v30 = vrot.slane %v1383_v24, 1 }
0x146f   :  { %v1388_v22 = vmul.f32 1.442695, %v1386_v29  ;;  %v1385_v15 = vmax.f32 %v1383_v24, %v1384_v30 }
0x1471   :  { %1839 = vpow2.f32 %v1388_v22  ;;  %v1387_v31 = vsub.f32 %v1371_v32, %v1385_v15 }
0x1473   :  { %v1390_v33 = vmul.f32 1.442695, %v1387_v31 }
0x1475   :  { %1841 = vpow2.f32 %v1390_v33 }
0x147e   :  { %v1840_v19 = vpop.eup %1839 }
0x147f   :  { %v1392_v60 = vsel %vm224_vm2, %v1840_v19, 0.0 }
0x1480   :  { %v1393_v28 = vrot.slane %v1392_v60, 4 }
0x1482   :  { %v1842_v26 = vpop.eup %1841  ;;  %v1394_v38 = vadd.f32 %v1393_v28, %v1392_v60 }
0x1483   :  { %v1399_v39 = vsel %vm224_vm2, %v1842_v26, 0.0 }
0x1484   :  { %v1395_v35 = vrot.slane %v1394_v38, 2  ;;  %v1400_v37 = vrot.slane %v1399_v39, 4 }
0x1486   :  { %v1396_v40 = vadd.f32 %v1395_v35, %v1394_v38  ;;  %v1401_v42 = vadd.f32 %v1400_v37, %v1399_v39 }
0x1488   :  { %v1397_v47 = vrot.slane %v1396_v40, 1  ;;  %v1402_v45 = vrot.slane %v1401_v42, 2 }
0x148a   :  { %v1398_v36 = vadd.f32 %v1397_v47, %v1396_v40  ;;  %v1403_v46 = vadd.f32 %v1402_v45, %v1401_v42 }
0x148c   :  { %1843 = vlog2.f32 %v1398_v36  ;;  %v1404_v53 = vrot.slane %v1403_v46, 1 }
0x148e   :  { %v1405_v9 = vadd.f32 %v1404_v53, %v1403_v46 }
0x1490   :  { %1845 = vlog2.f32 %v1405_v9 }
0x1499   :  { %v1844_v0 = vpop.eup %1843 }
0x149a   :  { %v1407_v48 = vmul.f32 0.6931472, %v1844_v0 }
0x149c   :  { %v1410_v50 = vadd.f32 %v1407_v48, %v1378_v63 }
0x149d   :  { %v1846_v54 = vpop.eup %1845 }
0x149e   :  { %v1412_v55 = vsub.f32 %v2032_v20, %v1410_v50  ;;  %v1409_v43 = vmul.f32 0.6931472, %v1846_v54 }
0x14a0   :  { %v1411_v58 = vadd.f32 %v1409_v43, %v1385_v15  ;;  %v2461_v49 = vsel %vm1432_vm9, %v2409_v11, %v1412_v55 }
0x14a1   :  { %v1446_v61 = vrot.slane %v2461_v49, %v1974_v56 }
0x14a2   :  { %v1413_v3 = vsub.f32 %v2037_v23, %v1411_v58 }
0x14a3   :  { %v1451_v57 = vadd.f32 %v1446_v61, %v1955_v34 }
0x14a4   :  { %v2470_v5 = vsel %vm1432_vm9, %v2418_v17, %v1413_v3 }
0x14a5   :  { %v1453_v7 = vsel %vm224_vm2, %v1451_v57, -inf  ;;  %v1450_v62 = vrot.slane %v2470_v5, %v1974_v56 }
0x14a6   :  { %1454 = vmax.xlane.f32.xlu1 %v1453_v7 }
0x14a7   :  { %v1452_v11 = vadd.f32 %v1450_v62, %v1968_v52 }
0x14a9   :  { %v1456_v2 = vsel %vm224_vm2, %v1452_v11, -inf }
0x14aa   :  { %1457 = vmax.xlane.f32.xlu0 %v1456_v2 }
0x152f   :  { %v1455_v14 = vpop.xlane.xlu1 %1454 }
0x1530   :  { %v1459_v32 = vsub.f32 %v1451_v57, %v1455_v14 }
0x1532   :  { %v1461_v10 = vmul.f32 1.442695, %v1459_v32 }
0x1533   :  { %v1458_v1 = vpop.xlane.xlu0 %1457 }
0x1534   :  { %1847 = vpow2.f32 %v1461_v10  ;;  %v1460_v6 = vsub.f32 %v1452_v11, %v1458_v1 }
0x1536   :  { %v1463_v13 = vmul.f32 1.442695, %v1460_v6 }
0x1538   :  { %1849 = vpow2.f32 %v1463_v13 }
0x1541   :  { %v1848_v17 = vpop.eup %1847 }
0x1542   :  { %v1465_v4 = vsel %vm224_vm2, %v1848_v17, 0.0 }
0x1543   :  { %1466 = vadd.xlane.f32.xlu1 %v1465_v4 }
0x1545   :  { %v1850_v25 = vpop.eup %1849 }
0x1546   :  { %v1468_v27 = vsel %vm224_vm2, %v1850_v25, 0.0 }
0x1547   :  { %1421 = vadd.xlane.f32.xlu1 %v2434_v59  ;;  %1469 = vadd.xlane.f32.xlu0 %v1468_v27 }
0x15cc   :  { %v1467_v41 = vpop.xlane.xlu1 %1466 }
0x15cd   :  { %1851 = vlog2.f32 %v1467_v41 }
0x15d0   :  { %v1422_v63 = vpop.xlane.xlu1 %1421  ;;  %v1470_v24 = vpop.xlane.xlu0 %1469 }
0x15d1   :  { %v1423_v29 = vrot.slane %v1422_v63, 4  ;;  %1853 = vlog2.f32 %v1470_v24 }
0x15d3   :  { %v1424_v30 = vadd.f32 %v1423_v29, %v1422_v63 }
0x15d5   :  { %v1425_v22 = vrot.slane %v1424_v30, 2 }
0x15d7   :  { %v1426_v15 = vadd.f32 %v1425_v22, %v1424_v30 }
0x15d9   :  { %v1427_v31 = vrot.slane %v1426_v15, 1 }
0x15da   :  { %v1852_v33 = vpop.eup %1851 }
0x15db   :  { %v1472_v19 = vmul.f32 0.6931472, %v1852_v33  ;;  %v1428_v60 = vadd.f32 %v1427_v31, %v1426_v15 }
0x15dd   :  { %1658 = vpush %v1428_v60  ;;  %v1475_v28 = vadd.f32 %v1472_v19, %v1455_v14 }
0x15de   :  { %v1854_v26 = vpop.eup %1853 }
0x15df   :  { %v1474_v38 = vmul.f32 0.6931472, %v1854_v26  ;;  %v1477_v59 = vsub.f32 %v2011_v16, %v1475_v28 }
0x15e1   :  { %1481 = vperm.xlu0 %1670, %v1477_v59   ;;  %v1476_v39 = vadd.f32 %v1474_v38, %v1458_v1 }
0x15e3   :  { %v1478_v35 = vsub.f32 %v2013_v18, %v1476_v39 }
0x15e5   :  { %1486 = vperm.xlu1 %1669, %v1478_v35  }
0x160e   :  { %s1659_s27 = spop %1658 }
0x160f   :  { %v1430_v37 = vstv %s1659_s27 }
0x1610   :  { %v1431_v40 = vmul.f32 0.0005, %v1430_v37 }
0x1612   :  { %vm1439_vm5 = vcmp.lt.f32.partialorder %v1431_v40, 0.1 }
0x1613   :  { %v1627_v42 = vsel %vm1439_vm5, 1.0, %v1915_v12 }
0x1614   :  { %v1442_v47 = vmax.f32 %v2438_v51, %v1627_v42 }
0x1616   :  { %vm2484_vm10 = vcmp.gt.f32.partialorder %v1442_v47, 0.0 }
0x1617   :  { %v1536_v16 = vsel %vm2484_vm10, %v2444_v21, %v1477_v59  ;;  %v1537_v18 = vsel %vm2484_vm10, %v2449_v8, %v1478_v35 }
0x1618   :  { %1542 = vperm.xlu1 %1669, %v1536_v16   ;;  %1547 = vperm.xlu0 %1670, %v1537_v18  }
0x165c   :  { %v1482_v36 = vpop.permute.xlu0 %1481 }
0x165d   :  { %v1489_v46 = vadd.f32 %v1482_v36, %v1955_v34 }
0x165f   :  { %v1491_v12 = vsel %vm224_vm2, %v1489_v46, -inf }
0x1660   :  { %v1492_v51 = vrot.slane %v1491_v12, 4  ;;  %v1487_v53 = vpop.permute.xlu1 %1486 }
0x1661   :  { %v1490_v9 = vadd.f32 %v1487_v53, %v1968_v52 }
0x1662   :  { %v1493_v0 = vmax.f32 %v1491_v12, %v1492_v51 }
0x1663   :  { %v1498_v48 = vsel %vm224_vm2, %v1490_v9, -inf }
0x1664   :  { %v1494_v50 = vrot.slane %v1493_v0, 2  ;;  %v1499_v21 = vrot.slane %v1498_v48, 4 }
0x1666   :  { %v1495_v54 = vmax.f32 %v1493_v0, %v1494_v50  ;;  %v1500_v55 = vmax.f32 %v1498_v48, %v1499_v21 }
0x1668   :  { %v1496_v43 = vrot.slane %v1495_v54, 1  ;;  %v1501_v8 = vrot.slane %v1500_v55, 2 }
0x166a   :  { %v1497_v58 = vmax.f32 %v1495_v54, %v1496_v43  ;;  %v1502_v61 = vmax.f32 %v1500_v55, %v1501_v8 }
0x166c   :  { %v1505_v3 = vsub.f32 %v1489_v46, %v1497_v58  ;;  %v1503_v57 = vrot.slane %v1502_v61, 1 }
0x166e   :  { %v1507_v7 = vmul.f32 1.442695, %v1505_v3  ;;  %v1504_v62 = vmax.f32 %v1502_v61, %v1503_v57 }
0x1670   :  { %1855 = vpow2.f32 %v1507_v7  ;;  %v1506_v11 = vsub.f32 %v1490_v9, %v1504_v62 }
0x1672   :  { %v1509_v2 = vmul.f32 1.442695, %v1506_v11 }
0x1674   :  { %1857 = vpow2.f32 %v1509_v2 }
0x167d   :  { %v1856_v14 = vpop.eup %1855 }
0x167e   :  { %v1511_v32 = vsel %vm224_vm2, %v1856_v14, 0.0 }
0x167f   :  { %v1512_v10 = vrot.slane %v1511_v32, 4 }
0x1681   :  { %v1858_v1 = vpop.eup %1857  ;;  %v1513_v6 = vadd.f32 %v1512_v10, %v1511_v32 }
0x1682   :  { %v1518_v13 = vsel %vm224_vm2, %v1858_v1, 0.0 }
0x1683   :  { %v1514_v17 = vrot.slane %v1513_v6, 2  ;;  %v1519_v4 = vrot.slane %v1518_v13, 4 }
0x1685   :  { %v1515_v25 = vadd.f32 %v1514_v17, %v1513_v6  ;;  %v1520_v27 = vadd.f32 %v1519_v4, %v1518_v13 }
0x1687   :  { %v1516_v41 = vrot.slane %v1515_v25, 1  ;;  %v1521_v63 = vrot.slane %v1520_v27, 2 }
0x1689   :  { %v1517_v24 = vadd.f32 %v1516_v41, %v1515_v25  ;;  %v1522_v29 = vadd.f32 %v1521_v63, %v1520_v27 }
0x168b   :  { %1859 = vlog2.f32 %v1517_v24  ;;  %v1523_v30 = vrot.slane %v1522_v29, 1 }
0x168d   :  { %v1524_v22 = vadd.f32 %v1523_v30, %v1522_v29 }
0x168f   :  { %1861 = vlog2.f32 %v1524_v22 }
0x1693   :  { %v1543_v26 = vpop.permute.xlu1 %1542  ;;  %v1548_v40 = vpop.permute.xlu0 %1547 }
0x1694   :  { %v1550_v39 = vadd.f32 %v1543_v26, %v1955_v34  ;;  %v1551_v18 = vadd.f32 %v1548_v40, %v1968_v52 }
0x1698   :  { %v1860_v15 = vpop.eup %1859 }
0x1699   :  { %v1526_v31 = vmul.f32 0.6931472, %v1860_v15 }
0x169b   :  { %v1529_v33 = vadd.f32 %v1526_v31, %v1497_v58 }
0x169c   :  { %v1862_v19 = vpop.eup %1861 }
0x169d   :  { %v1531_v60 = vsub.f32 %v2032_v20, %v1529_v33  ;;  %v1528_v28 = vmul.f32 0.6931472, %v1862_v19 }
0x169f   :  { %v1530_v38 = vadd.f32 %v1528_v28, %v1504_v62  ;;  %v1538_v59 = vsel %vm2484_vm10, %v2461_v49, %v1531_v60 }
0x16a0   :  { %v1555_v35 = vrot.slane %v1538_v59, %v1974_v56 }
0x16a1   :  { %v1532_v37 = vsub.f32 %v2037_v23, %v1530_v38 }
0x16a2   :  { %v1560_v42 = vadd.f32 %v1555_v35, %v1550_v39 }
0x16a3   :  { %v1539_v47 = vsel %vm2484_vm10, %v2470_v5, %v1532_v37 }
0x16a4   :  { %v1562_v20 = vmul.f32 1.442695, %v1560_v42  ;;  %v1559_v16 = vrot.slane %v1539_v47, %v1974_v56 }
0x16a6   :  { %1863 = vpow2.f32 %v1562_v20  ;;  %v1561_v36 = vadd.f32 %v1559_v16, %v1551_v18 }
0x16a8   :  { %v1564_v49 = vmul.f32 1.442695, %v1561_v36 }
0x16aa   :  { %1865 = vpow2.f32 %v1564_v49 }
0x16b3   :  { %v1864_v46 = vpop.eup %1863 }
0x16b4   :  { %v1566_v12 = vmul.f32 %v1864_v46, %v1955_v34 }
0x16b6   :  { %v1568_v23 = vsel %vm224_vm2, %v1566_v12, 0.0 }
0x16b7   :  { %v1866_v51 = vpop.eup %1865  ;;  %1569 = vadd.xlane.f32.xlu1 %v1568_v23 }
0x16b8   :  { %v1567_v53 = vmul.f32 %v1866_v51, %v1968_v52 }
0x16ba   :  { %v1571_v5 = vsel %vm224_vm2, %v1567_v53, 0.0 }
0x16bb   :  { %1572 = vadd.xlane.f32.xlu0 %v1571_v5 }
0x1740   :  { %v1570_v45 = vpop.xlane.xlu1 %1569 }
0x1741   :  { %v1579_v9 = vrot.slane %v1570_v45, %v1963_v44 }
0x1744   :  { %v1573_v56 = vpop.xlane.xlu0 %1572 }
0x1745   :  { %v1583_v0 = vrot.slane %v1573_v56, %v1963_v44 }
0x1747   :  { %v1584_v48 = vsel %vm262_vm3, %v1583_v0, %v1579_v9 }
0x1748   :  { %v1586_v50 = vsel %vm265_vm4, %v1584_v48, 0.0 }
0x1749   :  { %1587 = vadd.xlane.f32.xlu0 %v1586_v50 }
0x17d2   :  { %v1588_v34 = vpop.xlane.xlu0 %1587 }
0x17d3   :  { %v1589_v21 = vmul.f32 -0.001, %v1588_v34 }
0x17d5   :  { %v1591_v54 = vsel %vm1590_vm11, %v1589_v21, 0.0 }
0x17d6   :  { %1592 = vadd.xlane.f32.xlu1 %v1591_v54 }
0x185f   :  { %v1593_v52 = vpop.xlane.xlu1 %1592 }
0x1860   :  { %v1594_v55 = vrot.slane %v1593_v52, 4 }
0x1862   :  { %v1595_v43 = vadd.f32 %v1594_v55, %v1593_v52 }
0x1864   :  { %v1596_v8 = vrot.slane %v1595_v43, 2 }
0x1866   :  { %v1597_v58 = vadd.f32 %v1596_v8, %v1595_v43 }
0x1868   :  { %v1598_v61 = vrot.slane %v1597_v58, 1 }
0x186a   :  { %v1599_v3 = vadd.f32 %v1598_v61, %v1597_v58 }
0x186c   :  { %1660 = vpush %v1599_v3 }
0x189d   :  { %s1661_s28 = spop %1660 }
0x189e   :  { %p1601_p10 = scmp.ne.f32.partialorder %s1661_s28, %s1661_s28 }
0x18a0   :  { %s1602_s29 = scalar_select %p1601_p10, 1, 0 }
0x18a2   :  { %v1603_v44 = vstv %s1602_s29 }
0x18a3   :  { %vm1604_vm2 = vcmp.eq.s32.totalorder %v1603_v44, 1 }
0x18a4   :  { %v1605_v57 = vsel %vm1604_vm2, 1.0, %v1589_v21 }
0x18a5   :  { %1606 = vst.msk [vmem:[%s2527_s2] sm:$0x3] %vm1590_vm11, %v1605_v57 }
0x18a6   :  { %1611 = vsyncpa [#allocation3], 1 }
0x18a7   :  { %1612 = vsyncpa [#allocation5], 1 }

</bundles_post_ra>
